<compile_context>
chip_gen: v7x
topology: tpu7x:2x2x1
jax: 0.10.0
libtpu: 0.0.40
codegen_flags: <defaults>
</compile_context>

<pallas_src>
import jax
import jax.numpy as jnp
from jax.experimental import pallas as pl
from jax.experimental.pallas import tpu as pltpu

_BN_EPS = 1e-5
_CPAD = 128                        # lane-dense channel padding
_VMEM_LIMIT = 32 * 1024 * 1024     # explicit scoped-VMEM budget (v7x-safe)


# ----------------------------------------------------------------------------
# Pass A: conv3x3 (padding=1) via 9 shifted matmuls + batch-stat accumulation.
#   x_pad : [N, H+2, W+2, Cin]   (one padded image per grid step)
#   w     : [9, Cin, CPAD]       (tap-major GEMM weights, zero-padded channels)
#   y     : [N, H*W, CPAD] f32   pre-BN conv output
#   stats : [2, CPAD]      f32   row0 = sum, row1 = sum of squares over N*H*W
# ----------------------------------------------------------------------------
def _make_conv_stats_kernel(H, W, cin, cpad):
    HW = H * W

    def kernel(x_ref, w_ref, y_ref, stats_ref):
        @pl.when(pl.program_id(0) == 0)
        def _():
            stats_ref[...] = jnp.zeros_like(stats_ref)

        x = x_ref[0].astype(jnp.float32)                  # [H+2, W+2, Cin]
        if cin == 1:
            # conv1: K=9*1 on the MXU would be >90% zero padding -> VPU taps.
            acc = jnp.zeros((H, W, cpad), jnp.float32)
            for kh in range(3):
                for kw in range(3):
                    tap = x[kh:kh + H, kw:kw + W, :]                      # [H,W,1]
                    wt = w_ref[kh * 3 + kw].astype(jnp.float32)           # [1,cpad]
                    acc = acc + tap * wt.reshape(1, 1, cpad)
            acc = acc.reshape(HW, cpad)
        else:
            mxu_dtype = w_ref.dtype
            acc = jnp.zeros((HW, cpad), jnp.float32)
            for kh in range(3):
                for kw in range(3):
                    tap = x[kh:kh + H, kw:kw + W, :].reshape(HW, cin)
                    acc = acc + jnp.dot(tap.astype(mxu_dtype),
                                        w_ref[kh * 3 + kw],
                                        preferred_element_type=jnp.float32)

        y_ref[0] = acc
        s = jnp.sum(acc, axis=0, keepdims=True)
        ss = jnp.sum(acc * acc, axis=0, keepdims=True)
        stats_ref[...] = stats_ref[...] + jnp.concatenate([s, ss], axis=0)

    return kernel


def conv3x3_stats(x_pad, w):
    n, hp, wp, cin = x_pad.shape
    H, W = hp - 2, wp - 2
    HW = H * W
    cpad = w.shape[2]
    return pl.pallas_call(
        _make_conv_stats_kernel(H, W, cin, cpad),
        out_shape=(jax.ShapeDtypeStruct((n, HW, cpad), jnp.float32),
                   jax.ShapeDtypeStruct((2, cpad), jnp.float32)),
        grid=(n,),
        in_specs=[pl.BlockSpec((1, hp, wp, cin), lambda i: (i, 0, 0, 0)),
                  pl.BlockSpec((9, cin, cpad), lambda i: (0, 0, 0))],
        out_specs=(pl.BlockSpec((1, HW, cpad), lambda i: (i, 0, 0)),
                   pl.BlockSpec((2, cpad), lambda i: (0, 0))),
        compiler_params=pltpu.CompilerParams(
            dimension_semantics=("arbitrary",),   # stats accumulate across grid
            vmem_limit_bytes=_VMEM_LIMIT),
    )(x_pad, w)


# ----------------------------------------------------------------------------
# Pass B (layers 1 & 2): folded BatchNorm (scale/shift) + ReLU, bf16 output.
# ----------------------------------------------------------------------------
def _make_bn_relu_kernel(m_total):
    inv_m = 1.0 / float(m_total)

    def kernel(y_ref, stats_ref, g_ref, b_ref, o_ref):
        st = stats_ref[...]
        mean = st[0:1, :] * inv_m
        var = jnp.maximum(st[1:2, :] * inv_m - mean * mean, 0.0)  # biased var
        scale = g_ref[...] * jax.lax.rsqrt(var + _BN_EPS)
        shift = b_ref[...] - mean * scale
        o_ref[0] = jnp.maximum(y_ref[0] * scale + shift, 0.0).astype(o_ref.dtype)

    return kernel


def bn_relu(y, stats, gamma, beta, m_total, out_dtype=jnp.bfloat16):
    n, hw, c = y.shape
    return pl.pallas_call(
        _make_bn_relu_kernel(m_total),
        out_shape=jax.ShapeDtypeStruct((n, hw, c), out_dtype),
        grid=(n,),
        in_specs=[pl.BlockSpec((1, hw, c), lambda i: (i, 0, 0)),
                  pl.BlockSpec((2, c), lambda i: (0, 0)),
                  pl.BlockSpec((1, c), lambda i: (0, 0)),
                  pl.BlockSpec((1, c), lambda i: (0, 0))],
        out_specs=pl.BlockSpec((1, hw, c), lambda i: (i, 0, 0)),
        compiler_params=pltpu.CompilerParams(
            dimension_semantics=("parallel",),
            vmem_limit_bytes=_VMEM_LIMIT),
    )(y, stats, gamma, beta)


# ----------------------------------------------------------------------------
# Pass B (layer 3): folded BN + ReLU + global average pool + padded FC, fused.
#   logits out : [N, 1, CPAD]  (real logits in lanes 0..9)
# ----------------------------------------------------------------------------
def _make_bn_relu_pool_fc_kernel(m_total, hw):
    inv_m = 1.0 / float(m_total)
    inv_hw = 1.0 / float(hw)

    def kernel(y_ref, stats_ref, g_ref, b_ref, wfc_ref, bfc_ref, o_ref):
        st = stats_ref[...]
        mean = st[0:1, :] * inv_m
        var = jnp.maximum(st[1:2, :] * inv_m - mean * mean, 0.0)
        scale = g_ref[...] * jax.lax.rsqrt(var + _BN_EPS)
        shift = b_ref[...] - mean * scale
        act = jnp.maximum(y_ref[0] * scale + shift, 0.0)          # [HW, C]
        pooled = jnp.sum(act, axis=0, keepdims=True) * inv_hw     # [1, C]
        o_ref[0] = (jnp.dot(pooled, wfc_ref[...],
                            preferred_element_type=jnp.float32)
                    + bfc_ref[...])

    return kernel


def bn_relu_pool_fc(y, stats, gamma, beta, wfc, bfc, m_total):
    n, hw, c = y.shape
    cf = wfc.shape[1]
    out = pl.pallas_call(
        _make_bn_relu_pool_fc_kernel(m_total, hw),
        out_shape=jax.ShapeDtypeStruct((n, 1, cf), jnp.float32),
        grid=(n,),
        in_specs=[pl.BlockSpec((1, hw, c), lambda i: (i, 0, 0)),
                  pl.BlockSpec((2, c), lambda i: (0, 0)),
                  pl.BlockSpec((1, c), lambda i: (0, 0)),
                  pl.BlockSpec((1, c), lambda i: (0, 0)),
                  pl.BlockSpec((c, cf), lambda i: (0, 0)),
                  pl.BlockSpec((1, cf), lambda i: (0, 0))],
        out_specs=pl.BlockSpec((1, 1, cf), lambda i: (i, 0, 0)),
        compiler_params=pltpu.CompilerParams(
            dimension_semantics=("parallel",),
            vmem_limit_bytes=_VMEM_LIMIT),
    )(y, stats, gamma, beta, wfc, bfc)
    return out[:, 0, :]


# ----------------------------------------------------------------------------
# Parameters (deterministic, synthetic). Channel dims zero-padded to 128 lanes.
# NOTE: conv1/2/3 biases are omitted on purpose: with training-mode BatchNorm
#       the per-channel conv bias is exactly cancelled by the batch-mean
#       subtraction, so the forward output is mathematically independent of it.
# ----------------------------------------------------------------------------
def make_params(key):
    ks = jax.random.split(key, 8)

    def conv_w(k, cin, cout, cin_pad, dtype):
        # PyTorch conv weight [cout, cin, 3, 3] -> tap-major [9, cin_pad, CPAD]
        w = 0.1 * jax.random.normal(k, (cout, cin, 3, 3), jnp.float32)
        w = jnp.transpose(w, (2, 3, 1, 0)).reshape(9, cin, cout)
        w = jnp.pad(w, ((0, 0), (0, cin_pad - cin), (0, _CPAD - cout)))
        return w.astype(dtype)

    wfc = 0.1 * jax.random.normal(ks[6], (10, 128), jnp.float32)   # fc.weight
    wfc = jnp.pad(wfc.T, ((0, 0), (0, _CPAD - 10)))                # [128, 128]
    bfc = 0.1 * jax.random.normal(ks[7], (10,), jnp.float32)       # fc.bias
    bfc = jnp.pad(bfc, (0, _CPAD - 10)).reshape(1, _CPAD)

    return {
        "w1": conv_w(ks[0], 1, 32, 1, jnp.float32),          # VPU tap path (f32)
        "g1": jnp.ones((1, _CPAD), jnp.float32),
        "bt1": jnp.zeros((1, _CPAD), jnp.float32),
        "w2": conv_w(ks[2], 32, 64, _CPAD, jnp.bfloat16),    # bf16 MXU operands
        "g2": jnp.ones((1, _CPAD), jnp.float32),
        "bt2": jnp.zeros((1, _CPAD), jnp.float32),
        "w3": conv_w(ks[4], 64, 128, _CPAD, jnp.bfloat16),
        "g3": jnp.ones((1, _CPAD), jnp.float32),
        "bt3": jnp.zeros((1, _CPAD), jnp.float32),
        "wfc": wfc,
        "bfc": bfc,
    }


# ----------------------------------------------------------------------------
# Forward pass: NCHW input, matches SimpleNet(use_batchnorm=True) in train mode.
# ----------------------------------------------------------------------------
def simplenet_forward(x_nchw, params):
    n, _, h, w = x_nchw.shape
    m_total = n * h * w

    def spatial_pad(a_flat, cdim):
        # [N, H*W, C] -> zero-padded NHWC [N, H+2, W+2, C]  (conv padding=1)
        return jnp.pad(a_flat.reshape(n, h, w, cdim),
                       ((0, 0), (1, 1), (1, 1), (0, 0)))

    x = jnp.transpose(x_nchw, (0, 2, 3, 1))                        # NCHW -> NHWC
    xp = jnp.pad(x, ((0, 0), (1, 1), (1, 1), (0, 0)))

    # conv1 + bn1 + relu   (Cin=1: VPU taps; Cout 32 padded to 128 lanes)
    y1, s1 = conv3x3_stats(xp, params["w1"])
    a1 = bn_relu(y1, s1, params["g1"], params["bt1"], m_total)     # bf16 handoff

    # conv2 + bn2 + relu
    y2, s2 = conv3x3_stats(spatial_pad(a1, _CPAD), params["w2"])
    a2 = bn_relu(y2, s2, params["g2"], params["bt2"], m_total)

    # conv3 + bn3 + relu + adaptive_avg_pool(1,1) + fc   (fused epilogue)
    y3, s3 = conv3x3_stats(spatial_pad(a2, _CPAD), params["w3"])
    logits = bn_relu_pool_fc(y3, s3, params["g3"], params["bt3"],
                             params["wfc"], params["bfc"], m_total)
    return logits[:, :10]                                          # [N, 10]


if __name__ == "__main__":
    key = jax.random.PRNGKey(0)
    k_x, k_p = jax.random.split(key)

    # Input consistent with the module's conv1 (1 input channel); small shapes.
    N, C, H, W = 2, 1, 8, 8
    x = jax.random.normal(k_x, (N, C, H, W), jnp.float32)
    params = make_params(k_p)

    out = jax.jit(simplenet_forward)(x, params)
    jax.block_until_ready(out)
    assert out.shape == (N, 10)
    print("KERNEL_OK")
</pallas_src>

<mosaic_0001>
module attributes {stable_mosaic.version = 11 : i64} {
  func.func @kernel(%arg0: i32, %arg1: memref<1x64x128xf32, #tpu.memory_space<vmem>>, %arg2: memref<2x128xf32, #tpu.memory_space<vmem>>, %arg3: memref<1x128xf32, #tpu.memory_space<vmem>>, %arg4: memref<1x128xf32, #tpu.memory_space<vmem>>, %arg5: memref<1x64x128xbf16, #tpu.memory_space<vmem>>) attributes {dimension_semantics = [#tpu.dimension_semantics<parallel>], iteration_bounds = array<i64: 2>, scalar_prefetch = 0 : i64, scratch_operands = 0 : i64, tpu.core_type = #tpu.core_type<tc>, window_params = [{transform_indices = @transform_0, window_bounds = array<i64: 1, 64, 128>}, {pipeline_mode = #tpu.pipeline_mode<synchronous>, transform_indices = @transform_1, window_bounds = array<i64: 2, 128>}, {pipeline_mode = #tpu.pipeline_mode<synchronous>, transform_indices = @transform_2, window_bounds = array<i64: 1, 128>}, {pipeline_mode = #tpu.pipeline_mode<synchronous>, transform_indices = @transform_3, window_bounds = array<i64: 1, 128>}, {transform_indices = @transform_4, window_bounds = array<i64: 1, 64, 128>}]} {
    %c0 = arith.constant 0 : index
    %c0_0 = arith.constant 0 : index
    %0 = vector.load %arg2[%c0, %c0_0] : memref<2x128xf32, #tpu.memory_space<vmem>>, vector<2x128xf32>
    %1 = vector.extract_strided_slice %0 {offsets = [0, 0], sizes = [1, 128], strides = [1, 1]} : vector<2x128xf32> to vector<1x128xf32>
    %cst = arith.constant 7.812500e-03 : f32
    %2 = vector.broadcast %cst : f32 to vector<1x128xf32>
    %3 = arith.mulf %1, %2 : vector<1x128xf32>
    %4 = vector.extract_strided_slice %0 {offsets = [1, 0], sizes = [1, 128], strides = [1, 1]} : vector<2x128xf32> to vector<1x128xf32>
    %cst_1 = arith.constant 7.812500e-03 : f32
    %5 = vector.broadcast %cst_1 : f32 to vector<1x128xf32>
    %6 = arith.mulf %4, %5 : vector<1x128xf32>
    %7 = arith.mulf %3, %3 : vector<1x128xf32>
    %8 = arith.subf %6, %7 : vector<1x128xf32>
    %cst_2 = arith.constant 0.000000e+00 : f32
    %9 = vector.broadcast %cst_2 : f32 to vector<1x128xf32>
    %10 = arith.maximumf %8, %9 : vector<1x128xf32>
    %c0_3 = arith.constant 0 : index
    %c0_4 = arith.constant 0 : index
    %11 = vector.load %arg3[%c0_3, %c0_4] : memref<1x128xf32, #tpu.memory_space<vmem>>, vector<1x128xf32>
    %cst_5 = arith.constant 9.99999974E-6 : f32
    %12 = vector.broadcast %cst_5 : f32 to vector<1x128xf32>
    %13 = arith.addf %10, %12 : vector<1x128xf32>
    %14 = math.rsqrt %13 : vector<1x128xf32>
    %15 = arith.mulf %11, %14 : vector<1x128xf32>
    %c0_6 = arith.constant 0 : index
    %c0_7 = arith.constant 0 : index
    %16 = vector.load %arg4[%c0_6, %c0_7] : memref<1x128xf32, #tpu.memory_space<vmem>>, vector<1x128xf32>
    %17 = arith.mulf %3, %15 : vector<1x128xf32>
    %18 = arith.subf %16, %17 : vector<1x128xf32>
    %c0_8 = arith.constant 0 : index
    %c0_9 = arith.constant 0 : index
    %c0_10 = arith.constant 0 : index
    %19 = vector.load %arg1[%c0_8, %c0_9, %c0_10] : memref<1x64x128xf32, #tpu.memory_space<vmem>>, vector<1x64x128xf32>
    %20 = vector.shape_cast %19 : vector<1x64x128xf32> to vector<64x128xf32>
    %21 = vector.broadcast %15 : vector<1x128xf32> to vector<64x128xf32>
    %22 = arith.mulf %20, %21 : vector<64x128xf32>
    %23 = vector.broadcast %18 : vector<1x128xf32> to vector<64x128xf32>
    %24 = arith.addf %22, %23 : vector<64x128xf32>
    %cst_11 = arith.constant 0.000000e+00 : f32
    %25 = vector.broadcast %cst_11 : f32 to vector<64x128xf32>
    %26 = arith.maximumf %24, %25 : vector<64x128xf32>
    %27 = arith.truncf %26 : vector<64x128xf32> to vector<64x128xbf16>
    %c0_12 = arith.constant 0 : index
    %c0_13 = arith.constant 0 : index
    %c0_14 = arith.constant 0 : index
    %28 = vector.load %arg5[%c0_12, %c0_13, %c0_14] : memref<1x64x128xbf16, #tpu.memory_space<vmem>>, vector<1x64x128xbf16>
    %29 = vector.shape_cast %28 : vector<1x64x128xbf16> to vector<64x128xbf16>
    %30 = vector.shape_cast %27 : vector<64x128xbf16> to vector<1x64x128xbf16>
    tpu.vector_store %arg5[%c0_12, %c0_13, %c0_14], %30 {strides = array<i32>} : memref<1x64x128xbf16, #tpu.memory_space<vmem>>, vector<1x64x128xbf16>,
    return
  }
  func.func @transform_0(%arg0: i32) -> (i32, i32, i32) {
    %c0_i32 = arith.constant 0 : i32
    %c0_i32_0 = arith.constant 0 : i32
    %c0_i32_1 = arith.constant 0 : i32
    return %arg0, %c0_i32, %c0_i32_0 : i32, i32, i32
  }
  func.func @transform_1(%arg0: i32) -> (i32, i32) {
    %c0_i32 = arith.constant 0 : i32
    %c0_i32_0 = arith.constant 0 : i32
    %c0_i32_1 = arith.constant 0 : i32
    return %c0_i32, %c0_i32_0 : i32, i32
  }
  func.func @transform_2(%arg0: i32) -> (i32, i32) {
    %c0_i32 = arith.constant 0 : i32
    %c0_i32_0 = arith.constant 0 : i32
    %c0_i32_1 = arith.constant 0 : i32
    return %c0_i32, %c0_i32_0 : i32, i32
  }
  func.func @transform_3(%arg0: i32) -> (i32, i32) {
    %c0_i32 = arith.constant 0 : i32
    %c0_i32_0 = arith.constant 0 : i32
    %c0_i32_1 = arith.constant 0 : i32
    return %c0_i32, %c0_i32_0 : i32, i32
  }
  func.func @transform_4(%arg0: i32) -> (i32, i32, i32) {
    %c0_i32 = arith.constant 0 : i32
    %c0_i32_0 = arith.constant 0 : i32
    %c0_i32_1 = arith.constant 0 : i32
    return %arg0, %c0_i32, %c0_i32_0 : i32, i32, i32
  }
}

module attributes {stable_mosaic.version = 11 : i64} {
  func.func @kernel(%arg0: i32, %arg1: memref<1x10x10x1xf32, #tpu.memory_space<vmem>>, %arg2: memref<9x1x128xf32, #tpu.memory_space<vmem>>, %arg3: memref<1x64x128xf32, #tpu.memory_space<vmem>>, %arg4: memref<2x128xf32, #tpu.memory_space<vmem>>) attributes {dimension_semantics = [#tpu.dimension_semantics<arbitrary>], iteration_bounds = array<i64: 2>, scalar_prefetch = 0 : i64, scratch_operands = 0 : i64, tpu.core_type = #tpu.core_type<tc>, window_params = [{transform_indices = @transform_0, window_bounds = array<i64: 1, 10, 10, 1>}, {pipeline_mode = #tpu.pipeline_mode<synchronous>, transform_indices = @transform_1, window_bounds = array<i64: 9, 1, 128>}, {transform_indices = @transform_2, window_bounds = array<i64: 1, 64, 128>}, {pipeline_mode = #tpu.pipeline_mode<synchronous>, transform_indices = @transform_3, window_bounds = array<i64: 2, 128>}]} {
    %c0_i32 = arith.constant 0 : i32
    %0 = arith.cmpi eq, %arg0, %c0_i32 : i32
    %1 = arith.extui %0 : i1 to i32
    %c0_i32_0 = arith.constant 0 : i32
    %2 = arith.cmpi ne, %1, %c0_i32_0 : i32
    scf.if %2 {
      %cst_32 = arith.constant 0.000000e+00 : f32
      %91 = vector.broadcast %cst_32 : f32 to vector<2x128xf32>
      %c0_33 = arith.constant 0 : index
      %c0_34 = arith.constant 0 : index
      %92 = vector.load %arg4[%c0_33, %c0_34] : memref<2x128xf32, #tpu.memory_space<vmem>>, vector<2x128xf32>
      tpu.vector_store %arg4[%c0_33, %c0_34], %91 {strides = array<i32>} : memref<2x128xf32, #tpu.memory_space<vmem>>, vector<2x128xf32>,
    } else {
    }
    %c0 = arith.constant 0 : index
    %c0_1 = arith.constant 0 : index
    %c0_2 = arith.constant 0 : index
    %c0_3 = arith.constant 0 : index
    %3 = vector.load %arg1[%c0, %c0_1, %c0_2, %c0_3] : memref<1x10x10x1xf32, #tpu.memory_space<vmem>>, vector<1x10x10x1xf32>
    %4 = vector.shape_cast %3 : vector<1x10x10x1xf32> to vector<10x10x1xf32>
    %cst = arith.constant 0.000000e+00 : f32
    %5 = vector.broadcast %cst : f32 to vector<8x8x128xf32>
    %6 = vector.extract_strided_slice %4 {offsets = [0, 0, 0], sizes = [8, 8, 1], strides = [1, 1, 1]} : vector<10x10x1xf32> to vector<8x8x1xf32>
    %c0_4 = arith.constant 0 : index
    %c0_5 = arith.constant 0 : index
    %c0_6 = arith.constant 0 : index
    %7 = vector.load %arg2[%c0_4, %c0_5, %c0_6] : memref<9x1x128xf32, #tpu.memory_space<vmem>>, vector<1x1x128xf32>
    %8 = vector.shape_cast %7 : vector<1x1x128xf32> to vector<1x128xf32>
    %9 = vector.shape_cast %8 : vector<1x128xf32> to vector<1x1x128xf32>
    %10 = vector.broadcast %6 : vector<8x8x1xf32> to vector<8x8x128xf32>
    %11 = vector.broadcast %9 : vector<1x1x128xf32> to vector<8x8x128xf32>
    %12 = arith.mulf %10, %11 : vector<8x8x128xf32>
    %13 = arith.addf %5, %12 : vector<8x8x128xf32>
    %14 = vector.extract_strided_slice %4 {offsets = [0, 1, 0], sizes = [8, 8, 1], strides = [1, 1, 1]} : vector<10x10x1xf32> to vector<8x8x1xf32>
    %c1 = arith.constant 1 : index
    %c0_7 = arith.constant 0 : index
    %c0_8 = arith.constant 0 : index
    %15 = vector.load %arg2[%c1, %c0_7, %c0_8] : memref<9x1x128xf32, #tpu.memory_space<vmem>>, vector<1x1x128xf32>
    %16 = vector.shape_cast %15 : vector<1x1x128xf32> to vector<1x128xf32>
    %17 = vector.shape_cast %16 : vector<1x128xf32> to vector<1x1x128xf32>
    %18 = vector.broadcast %14 : vector<8x8x1xf32> to vector<8x8x128xf32>
    %19 = vector.broadcast %17 : vector<1x1x128xf32> to vector<8x8x128xf32>
    %20 = arith.mulf %18, %19 : vector<8x8x128xf32>
    %21 = arith.addf %13, %20 : vector<8x8x128xf32>
    %22 = vector.extract_strided_slice %4 {offsets = [0, 2, 0], sizes = [8, 8, 1], strides = [1, 1, 1]} : vector<10x10x1xf32> to vector<8x8x1xf32>
    %c2 = arith.constant 2 : index
    %c0_9 = arith.constant 0 : index
    %c0_10 = arith.constant 0 : index
    %23 = vector.load %arg2[%c2, %c0_9, %c0_10] : memref<9x1x128xf32, #tpu.memory_space<vmem>>, vector<1x1x128xf32>
    %24 = vector.shape_cast %23 : vector<1x1x128xf32> to vector<1x128xf32>
    %25 = vector.shape_cast %24 : vector<1x128xf32> to vector<1x1x128xf32>
    %26 = vector.broadcast %22 : vector<8x8x1xf32> to vector<8x8x128xf32>
    %27 = vector.broadcast %25 : vector<1x1x128xf32> to vector<8x8x128xf32>
    %28 = arith.mulf %26, %27 : vector<8x8x128xf32>
    %29 = arith.addf %21, %28 : vector<8x8x128xf32>
    %30 = vector.extract_strided_slice %4 {offsets = [1, 0, 0], sizes = [8, 8, 1], strides = [1, 1, 1]} : vector<10x10x1xf32> to vector<8x8x1xf32>
    %c3 = arith.constant 3 : index
    %c0_11 = arith.constant 0 : index
    %c0_12 = arith.constant 0 : index
    %31 = vector.load %arg2[%c3, %c0_11, %c0_12] : memref<9x1x128xf32, #tpu.memory_space<vmem>>, vector<1x1x128xf32>
    %32 = vector.shape_cast %31 : vector<1x1x128xf32> to vector<1x128xf32>
    %33 = vector.shape_cast %32 : vector<1x128xf32> to vector<1x1x128xf32>
    %34 = vector.broadcast %30 : vector<8x8x1xf32> to vector<8x8x128xf32>
    %35 = vector.broadcast %33 : vector<1x1x128xf32> to vector<8x8x128xf32>
    %36 = arith.mulf %34, %35 : vector<8x8x128xf32>
    %37 = arith.addf %29, %36 : vector<8x8x128xf32>
    %38 = vector.extract_strided_slice %4 {offsets = [1, 1, 0], sizes = [8, 8, 1], strides = [1, 1, 1]} : vector<10x10x1xf32> to vector<8x8x1xf32>
    %c4 = arith.constant 4 : index
    %c0_13 = arith.constant 0 : index
    %c0_14 = arith.constant 0 : index
    %39 = vector.load %arg2[%c4, %c0_13, %c0_14] : memref<9x1x128xf32, #tpu.memory_space<vmem>>, vector<1x1x128xf32>
    %40 = vector.shape_cast %39 : vector<1x1x128xf32> to vector<1x128xf32>
    %41 = vector.shape_cast %40 : vector<1x128xf32> to vector<1x1x128xf32>
    %42 = vector.broadcast %38 : vector<8x8x1xf32> to vector<8x8x128xf32>
    %43 = vector.broadcast %41 : vector<1x1x128xf32> to vector<8x8x128xf32>
    %44 = arith.mulf %42, %43 : vector<8x8x128xf32>
    %45 = arith.addf %37, %44 : vector<8x8x128xf32>
    %46 = vector.extract_strided_slice %4 {offsets = [1, 2, 0], sizes = [8, 8, 1], strides = [1, 1, 1]} : vector<10x10x1xf32> to vector<8x8x1xf32>
    %c5 = arith.constant 5 : index
    %c0_15 = arith.constant 0 : index
    %c0_16 = arith.constant 0 : index
    %47 = vector.load %arg2[%c5, %c0_15, %c0_16] : memref<9x1x128xf32, #tpu.memory_space<vmem>>, vector<1x1x128xf32>
    %48 = vector.shape_cast %47 : vector<1x1x128xf32> to vector<1x128xf32>
    %49 = vector.shape_cast %48 : vector<1x128xf32> to vector<1x1x128xf32>
    %50 = vector.broadcast %46 : vector<8x8x1xf32> to vector<8x8x128xf32>
    %51 = vector.broadcast %49 : vector<1x1x128xf32> to vector<8x8x128xf32>
    %52 = arith.mulf %50, %51 : vector<8x8x128xf32>
    %53 = arith.addf %45, %52 : vector<8x8x128xf32>
    %54 = vector.extract_strided_slice %4 {offsets = [2, 0, 0], sizes = [8, 8, 1], strides = [1, 1, 1]} : vector<10x10x1xf32> to vector<8x8x1xf32>
    %c6 = arith.constant 6 : index
    %c0_17 = arith.constant 0 : index
    %c0_18 = arith.constant 0 : index
    %55 = vector.load %arg2[%c6, %c0_17, %c0_18] : memref<9x1x128xf32, #tpu.memory_space<vmem>>, vector<1x1x128xf32>
    %56 = vector.shape_cast %55 : vector<1x1x128xf32> to vector<1x128xf32>
    %57 = vector.shape_cast %56 : vector<1x128xf32> to vector<1x1x128xf32>
    %58 = vector.broadcast %54 : vector<8x8x1xf32> to vector<8x8x128xf32>
    %59 = vector.broadcast %57 : vector<1x1x128xf32> to vector<8x8x128xf32>
    %60 = arith.mulf %58, %59 : vector<8x8x128xf32>
    %61 = arith.addf %53, %60 : vector<8x8x128xf32>
    %62 = vector.extract_strided_slice %4 {offsets = [2, 1, 0], sizes = [8, 8, 1], strides = [1, 1, 1]} : vector<10x10x1xf32> to vector<8x8x1xf32>
    %c7 = arith.constant 7 : index
    %c0_19 = arith.constant 0 : index
    %c0_20 = arith.constant 0 : index
    %63 = vector.load %arg2[%c7, %c0_19, %c0_20] : memref<9x1x128xf32, #tpu.memory_space<vmem>>, vector<1x1x128xf32>
    %64 = vector.shape_cast %63 : vector<1x1x128xf32> to vector<1x128xf32>
    %65 = vector.shape_cast %64 : vector<1x128xf32> to vector<1x1x128xf32>
    %66 = vector.broadcast %62 : vector<8x8x1xf32> to vector<8x8x128xf32>
    %67 = vector.broadcast %65 : vector<1x1x128xf32> to vector<8x8x128xf32>
    %68 = arith.mulf %66, %67 : vector<8x8x128xf32>
    %69 = arith.addf %61, %68 : vector<8x8x128xf32>
    %70 = vector.extract_strided_slice %4 {offsets = [2, 2, 0], sizes = [8, 8, 1], strides = [1, 1, 1]} : vector<10x10x1xf32> to vector<8x8x1xf32>
    %c8 = arith.constant 8 : index
    %c0_21 = arith.constant 0 : index
    %c0_22 = arith.constant 0 : index
    %71 = vector.load %arg2[%c8, %c0_21, %c0_22] : memref<9x1x128xf32, #tpu.memory_space<vmem>>, vector<1x1x128xf32>
    %72 = vector.shape_cast %71 : vector<1x1x128xf32> to vector<1x128xf32>
    %73 = vector.shape_cast %72 : vector<1x128xf32> to vector<1x1x128xf32>
    %74 = vector.broadcast %70 : vector<8x8x1xf32> to vector<8x8x128xf32>
    %75 = vector.broadcast %73 : vector<1x1x128xf32> to vector<8x8x128xf32>
    %76 = arith.mulf %74, %75 : vector<8x8x128xf32>
    %77 = arith.addf %69, %76 : vector<8x8x128xf32>
    %78 = vector.shape_cast %77 : vector<8x8x128xf32> to vector<64x128xf32>
    %c0_23 = arith.constant 0 : index
    %c0_24 = arith.constant 0 : index
    %c0_25 = arith.constant 0 : index
    %79 = vector.load %arg3[%c0_23, %c0_24, %c0_25] : memref<1x64x128xf32, #tpu.memory_space<vmem>>, vector<1x64x128xf32>
    %80 = vector.shape_cast %79 : vector<1x64x128xf32> to vector<64x128xf32>
    %81 = vector.shape_cast %78 : vector<64x128xf32> to vector<1x64x128xf32>
    tpu.vector_store %arg3[%c0_23, %c0_24, %c0_25], %81 {strides = array<i32>} : memref<1x64x128xf32, #tpu.memory_space<vmem>>, vector<1x64x128xf32>,
    %cst_26 = arith.constant dense<0.000000e+00> : vector<128xf32>
    %82 = vector.multi_reduction <add>, %78, %cst_26 [0] : vector<64x128xf32> to vector<128xf32>
    %83 = vector.shape_cast %82 : vector<128xf32> to vector<1x128xf32>
    %84 = arith.mulf %78, %78 : vector<64x128xf32>
    %cst_27 = arith.constant dense<0.000000e+00> : vector<128xf32>
    %85 = vector.multi_reduction <add>, %84, %cst_27 [0] : vector<64x128xf32> to vector<128xf32>
    %86 = vector.shape_cast %85 : vector<128xf32> to vector<1x128xf32>
    %c0_28 = arith.constant 0 : index
    %c0_29 = arith.constant 0 : index
    %87 = vector.load %arg4[%c0_28, %c0_29] : memref<2x128xf32, #tpu.memory_space<vmem>>, vector<2x128xf32>
    %88 = tpu.concatenate %83, %86 in 0 : vector<1x128xf32>, vector<1x128xf32> -> vector<2x128xf32>
    %89 = arith.addf %87, %88 : vector<2x128xf32>
    %c0_30 = arith.constant 0 : index
    %c0_31 = arith.constant 0 : index
    %90 = vector.load %arg4[%c0_30, %c0_31] : memref<2x128xf32, #tpu.memory_space<vmem>>, vector<2x128xf32>
    tpu.vector_store %arg4[%c0_30, %c0_31], %89 {strides = array<i32>} : memref<2x128xf32, #tpu.memory_space<vmem>>, vector<2x128xf32>,
    return
  }
  func.func @transform_0(%arg0: i32) -> (i32, i32, i32, i32) {
    %c0_i32 = arith.constant 0 : i32
    %c0_i32_0 = arith.constant 0 : i32
    %c0_i32_1 = arith.constant 0 : i32
    %c0_i32_2 = arith.constant 0 : i32
    return %arg0, %c0_i32, %c0_i32_0, %c0_i32_1 : i32, i32, i32, i32
  }
  func.func @transform_1(%arg0: i32) -> (i32, i32, i32) {
    %c0_i32 = arith.constant 0 : i32
    %c0_i32_0 = arith.constant 0 : i32
    %c0_i32_1 = arith.constant 0 : i32
    %c0_i32_2 = arith.constant 0 : i32
    return %c0_i32, %c0_i32_0, %c0_i32_1 : i32, i32, i32
  }
  func.func @transform_2(%arg0: i32) -> (i32, i32, i32) {
    %c0_i32 = arith.constant 0 : i32
    %c0_i32_0 = arith.constant 0 : i32
    %c0_i32_1 = arith.constant 0 : i32
    return %arg0, %c0_i32, %c0_i32_0 : i32, i32, i32
  }
  func.func @transform_3(%arg0: i32) -> (i32, i32) {
    %c0_i32 = arith.constant 0 : i32
    %c0_i32_0 = arith.constant 0 : i32
    %c0_i32_1 = arith.constant 0 : i32
    return %c0_i32, %c0_i32_0 : i32, i32
  }
}

module attributes {stable_mosaic.version = 11 : i64} {
  func.func @kernel(%arg0: i32, %arg1: memref<1x10x10x128xbf16, #tpu.memory_space<vmem>>, %arg2: memref<9x128x128xbf16, #tpu.memory_space<vmem>>, %arg3: memref<1x64x128xf32, #tpu.memory_space<vmem>>, %arg4: memref<2x128xf32, #tpu.memory_space<vmem>>) attributes {dimension_semantics = [#tpu.dimension_semantics<arbitrary>], iteration_bounds = array<i64: 2>, scalar_prefetch = 0 : i64, scratch_operands = 0 : i64, tpu.core_type = #tpu.core_type<tc>, window_params = [{transform_indices = @transform_0, window_bounds = array<i64: 1, 10, 10, 128>}, {pipeline_mode = #tpu.pipeline_mode<synchronous>, transform_indices = @transform_1, window_bounds = array<i64: 9, 128, 128>}, {transform_indices = @transform_2, window_bounds = array<i64: 1, 64, 128>}, {pipeline_mode = #tpu.pipeline_mode<synchronous>, transform_indices = @transform_3, window_bounds = array<i64: 2, 128>}]} {
    %c0_i32 = arith.constant 0 : i32
    %0 = arith.cmpi eq, %arg0, %c0_i32 : i32
    %1 = arith.extui %0 : i1 to i32
    %c0_i32_0 = arith.constant 0 : i32
    %2 = arith.cmpi ne, %1, %c0_i32_0 : i32
    scf.if %2 {
      %cst_41 = arith.constant 0.000000e+00 : f32
      %82 = vector.broadcast %cst_41 : f32 to vector<2x128xf32>
      %c0_42 = arith.constant 0 : index
      %c0_43 = arith.constant 0 : index
      %83 = vector.load %arg4[%c0_42, %c0_43] : memref<2x128xf32, #tpu.memory_space<vmem>>, vector<2x128xf32>
      tpu.vector_store %arg4[%c0_42, %c0_43], %82 {strides = array<i32>} : memref<2x128xf32, #tpu.memory_space<vmem>>, vector<2x128xf32>,
    } else {
    }
    %c0 = arith.constant 0 : index
    %c0_1 = arith.constant 0 : index
    %c0_2 = arith.constant 0 : index
    %c0_3 = arith.constant 0 : index
    %3 = vector.load %arg1[%c0, %c0_1, %c0_2, %c0_3] : memref<1x10x10x128xbf16, #tpu.memory_space<vmem>>, vector<1x10x10x128xbf16>
    %4 = vector.shape_cast %3 : vector<1x10x10x128xbf16> to vector<10x10x128xbf16>
    %5 = arith.extf %4 : vector<10x10x128xbf16> to vector<10x10x128xf32>
    %cst = arith.constant 0.000000e+00 : f32
    %6 = vector.broadcast %cst : f32 to vector<64x128xf32>
    %7 = vector.extract_strided_slice %5 {offsets = [0, 0, 0], sizes = [8, 8, 128], strides = [1, 1, 1]} : vector<10x10x128xf32> to vector<8x8x128xf32>
    %8 = vector.shape_cast %7 : vector<8x8x128xf32> to vector<64x128xf32>
    %9 = arith.truncf %8 : vector<64x128xf32> to vector<64x128xbf16>
    %c0_4 = arith.constant 0 : index
    %c0_5 = arith.constant 0 : index
    %c0_6 = arith.constant 0 : index
    %10 = vector.load %arg2[%c0_4, %c0_5, %c0_6] : memref<9x128x128xbf16, #tpu.memory_space<vmem>>, vector<1x128x128xbf16>
    %11 = vector.shape_cast %10 : vector<1x128x128xbf16> to vector<128x128xbf16>
    %cst_7 = arith.constant dense<0.000000e+00> : vector<64x128xf32>
    %12 = tpu.matmul %9, %11, %cst_7 {dimension_numbers = #tpu.dot_dimension_numbers<[1], [0], [0], [1], [0, 0, 1, 1], [], []>} : vector<64x128xbf16>, vector<128x128xbf16>, vector<64x128xf32> -> vector<64x128xf32>
    %13 = arith.addf %6, %12 : vector<64x128xf32>
    %14 = vector.extract_strided_slice %5 {offsets = [0, 1, 0], sizes = [8, 8, 128], strides = [1, 1, 1]} : vector<10x10x128xf32> to vector<8x8x128xf32>
    %15 = vector.shape_cast %14 : vector<8x8x128xf32> to vector<64x128xf32>
    %16 = arith.truncf %15 : vector<64x128xf32> to vector<64x128xbf16>
    %c1 = arith.constant 1 : index
    %c0_8 = arith.constant 0 : index
    %c0_9 = arith.constant 0 : index
    %17 = vector.load %arg2[%c1, %c0_8, %c0_9] : memref<9x128x128xbf16, #tpu.memory_space<vmem>>, vector<1x128x128xbf16>
    %18 = vector.shape_cast %17 : vector<1x128x128xbf16> to vector<128x128xbf16>
    %cst_10 = arith.constant dense<0.000000e+00> : vector<64x128xf32>
    %19 = tpu.matmul %16, %18, %cst_10 {dimension_numbers = #tpu.dot_dimension_numbers<[1], [0], [0], [1], [0, 0, 1, 1], [], []>} : vector<64x128xbf16>, vector<128x128xbf16>, vector<64x128xf32> -> vector<64x128xf32>
    %20 = arith.addf %13, %19 : vector<64x128xf32>
    %21 = vector.extract_strided_slice %5 {offsets = [0, 2, 0], sizes = [8, 8, 128], strides = [1, 1, 1]} : vector<10x10x128xf32> to vector<8x8x128xf32>
    %22 = vector.shape_cast %21 : vector<8x8x128xf32> to vector<64x128xf32>
    %23 = arith.truncf %22 : vector<64x128xf32> to vector<64x128xbf16>
    %c2 = arith.constant 2 : index
    %c0_11 = arith.constant 0 : index
    %c0_12 = arith.constant 0 : index
    %24 = vector.load %arg2[%c2, %c0_11, %c0_12] : memref<9x128x128xbf16, #tpu.memory_space<vmem>>, vector<1x128x128xbf16>
    %25 = vector.shape_cast %24 : vector<1x128x128xbf16> to vector<128x128xbf16>
    %cst_13 = arith.constant dense<0.000000e+00> : vector<64x128xf32>
    %26 = tpu.matmul %23, %25, %cst_13 {dimension_numbers = #tpu.dot_dimension_numbers<[1], [0], [0], [1], [0, 0, 1, 1], [], []>} : vector<64x128xbf16>, vector<128x128xbf16>, vector<64x128xf32> -> vector<64x128xf32>
    %27 = arith.addf %20, %26 : vector<64x128xf32>
    %28 = vector.extract_strided_slice %5 {offsets = [1, 0, 0], sizes = [8, 8, 128], strides = [1, 1, 1]} : vector<10x10x128xf32> to vector<8x8x128xf32>
    %29 = vector.shape_cast %28 : vector<8x8x128xf32> to vector<64x128xf32>
    %30 = arith.truncf %29 : vector<64x128xf32> to vector<64x128xbf16>
    %c3 = arith.constant 3 : index
    %c0_14 = arith.constant 0 : index
    %c0_15 = arith.constant 0 : index
    %31 = vector.load %arg2[%c3, %c0_14, %c0_15] : memref<9x128x128xbf16, #tpu.memory_space<vmem>>, vector<1x128x128xbf16>
    %32 = vector.shape_cast %31 : vector<1x128x128xbf16> to vector<128x128xbf16>
    %cst_16 = arith.constant dense<0.000000e+00> : vector<64x128xf32>
    %33 = tpu.matmul %30, %32, %cst_16 {dimension_numbers = #tpu.dot_dimension_numbers<[1], [0], [0], [1], [0, 0, 1, 1], [], []>} : vector<64x128xbf16>, vector<128x128xbf16>, vector<64x128xf32> -> vector<64x128xf32>
    %34 = arith.addf %27, %33 : vector<64x128xf32>
    %35 = vector.extract_strided_slice %5 {offsets = [1, 1, 0], sizes = [8, 8, 128], strides = [1, 1, 1]} : vector<10x10x128xf32> to vector<8x8x128xf32>
    %36 = vector.shape_cast %35 : vector<8x8x128xf32> to vector<64x128xf32>
    %37 = arith.truncf %36 : vector<64x128xf32> to vector<64x128xbf16>
    %c4 = arith.constant 4 : index
    %c0_17 = arith.constant 0 : index
    %c0_18 = arith.constant 0 : index
    %38 = vector.load %arg2[%c4, %c0_17, %c0_18] : memref<9x128x128xbf16, #tpu.memory_space<vmem>>, vector<1x128x128xbf16>
    %39 = vector.shape_cast %38 : vector<1x128x128xbf16> to vector<128x128xbf16>
    %cst_19 = arith.constant dense<0.000000e+00> : vector<64x128xf32>
    %40 = tpu.matmul %37, %39, %cst_19 {dimension_numbers = #tpu.dot_dimension_numbers<[1], [0], [0], [1], [0, 0, 1, 1], [], []>} : vector<64x128xbf16>, vector<128x128xbf16>, vector<64x128xf32> -> vector<64x128xf32>
    %41 = arith.addf %34, %40 : vector<64x128xf32>
    %42 = vector.extract_strided_slice %5 {offsets = [1, 2, 0], sizes = [8, 8, 128], strides = [1, 1, 1]} : vector<10x10x128xf32> to vector<8x8x128xf32>
    %43 = vector.shape_cast %42 : vector<8x8x128xf32> to vector<64x128xf32>
    %44 = arith.truncf %43 : vector<64x128xf32> to vector<64x128xbf16>
    %c5 = arith.constant 5 : index
    %c0_20 = arith.constant 0 : index
    %c0_21 = arith.constant 0 : index
    %45 = vector.load %arg2[%c5, %c0_20, %c0_21] : memref<9x128x128xbf16, #tpu.memory_space<vmem>>, vector<1x128x128xbf16>
    %46 = vector.shape_cast %45 : vector<1x128x128xbf16> to vector<128x128xbf16>
    %cst_22 = arith.constant dense<0.000000e+00> : vector<64x128xf32>
    %47 = tpu.matmul %44, %46, %cst_22 {dimension_numbers = #tpu.dot_dimension_numbers<[1], [0], [0], [1], [0, 0, 1, 1], [], []>} : vector<64x128xbf16>, vector<128x128xbf16>, vector<64x128xf32> -> vector<64x128xf32>
    %48 = arith.addf %41, %47 : vector<64x128xf32>
    %49 = vector.extract_strided_slice %5 {offsets = [2, 0, 0], sizes = [8, 8, 128], strides = [1, 1, 1]} : vector<10x10x128xf32> to vector<8x8x128xf32>
    %50 = vector.shape_cast %49 : vector<8x8x128xf32> to vector<64x128xf32>
    %51 = arith.truncf %50 : vector<64x128xf32> to vector<64x128xbf16>
    %c6 = arith.constant 6 : index
    %c0_23 = arith.constant 0 : index
    %c0_24 = arith.constant 0 : index
    %52 = vector.load %arg2[%c6, %c0_23, %c0_24] : memref<9x128x128xbf16, #tpu.memory_space<vmem>>, vector<1x128x128xbf16>
    %53 = vector.shape_cast %52 : vector<1x128x128xbf16> to vector<128x128xbf16>
    %cst_25 = arith.constant dense<0.000000e+00> : vector<64x128xf32>
    %54 = tpu.matmul %51, %53, %cst_25 {dimension_numbers = #tpu.dot_dimension_numbers<[1], [0], [0], [1], [0, 0, 1, 1], [], []>} : vector<64x128xbf16>, vector<128x128xbf16>, vector<64x128xf32> -> vector<64x128xf32>
    %55 = arith.addf %48, %54 : vector<64x128xf32>
    %56 = vector.extract_strided_slice %5 {offsets = [2, 1, 0], sizes = [8, 8, 128], strides = [1, 1, 1]} : vector<10x10x128xf32> to vector<8x8x128xf32>
    %57 = vector.shape_cast %56 : vector<8x8x128xf32> to vector<64x128xf32>
    %58 = arith.truncf %57 : vector<64x128xf32> to vector<64x128xbf16>
    %c7 = arith.constant 7 : index
    %c0_26 = arith.constant 0 : index
    %c0_27 = arith.constant 0 : index
    %59 = vector.load %arg2[%c7, %c0_26, %c0_27] : memref<9x128x128xbf16, #tpu.memory_space<vmem>>, vector<1x128x128xbf16>
    %60 = vector.shape_cast %59 : vector<1x128x128xbf16> to vector<128x128xbf16>
    %cst_28 = arith.constant dense<0.000000e+00> : vector<64x128xf32>
    %61 = tpu.matmul %58, %60, %cst_28 {dimension_numbers = #tpu.dot_dimension_numbers<[1], [0], [0], [1], [0, 0, 1, 1], [], []>} : vector<64x128xbf16>, vector<128x128xbf16>, vector<64x128xf32> -> vector<64x128xf32>
    %62 = arith.addf %55, %61 : vector<64x128xf32>
    %63 = vector.extract_strided_slice %5 {offsets = [2, 2, 0], sizes = [8, 8, 128], strides = [1, 1, 1]} : vector<10x10x128xf32> to vector<8x8x128xf32>
    %64 = vector.shape_cast %63 : vector<8x8x128xf32> to vector<64x128xf32>
    %65 = arith.truncf %64 : vector<64x128xf32> to vector<64x128xbf16>
    %c8 = arith.constant 8 : index
    %c0_29 = arith.constant 0 : index
    %c0_30 = arith.constant 0 : index
    %66 = vector.load %arg2[%c8, %c0_29, %c0_30] : memref<9x128x128xbf16, #tpu.memory_space<vmem>>, vector<1x128x128xbf16>
    %67 = vector.shape_cast %66 : vector<1x128x128xbf16> to vector<128x128xbf16>
    %cst_31 = arith.constant dense<0.000000e+00> : vector<64x128xf32>
    %68 = tpu.matmul %65, %67, %cst_31 {dimension_numbers = #tpu.dot_dimension_numbers<[1], [0], [0], [1], [0, 0, 1, 1], [], []>} : vector<64x128xbf16>, vector<128x128xbf16>, vector<64x128xf32> -> vector<64x128xf32>
    %69 = arith.addf %62, %68 : vector<64x128xf32>
    %c0_32 = arith.constant 0 : index
    %c0_33 = arith.constant 0 : index
    %c0_34 = arith.constant 0 : index
    %70 = vector.load %arg3[%c0_32, %c0_33, %c0_34] : memref<1x64x128xf32, #tpu.memory_space<vmem>>, vector<1x64x128xf32>
    %71 = vector.shape_cast %70 : vector<1x64x128xf32> to vector<64x128xf32>
    %72 = vector.shape_cast %69 : vector<64x128xf32> to vector<1x64x128xf32>
    tpu.vector_store %arg3[%c0_32, %c0_33, %c0_34], %72 {strides = array<i32>} : memref<1x64x128xf32, #tpu.memory_space<vmem>>, vector<1x64x128xf32>,
    %cst_35 = arith.constant dense<0.000000e+00> : vector<128xf32>
    %73 = vector.multi_reduction <add>, %69, %cst_35 [0] : vector<64x128xf32> to vector<128xf32>
    %74 = vector.shape_cast %73 : vector<128xf32> to vector<1x128xf32>
    %75 = arith.mulf %69, %69 : vector<64x128xf32>
    %cst_36 = arith.constant dense<0.000000e+00> : vector<128xf32>
    %76 = vector.multi_reduction <add>, %75, %cst_36 [0] : vector<64x128xf32> to vector<128xf32>
    %77 = vector.shape_cast %76 : vector<128xf32> to vector<1x128xf32>
    %c0_37 = arith.constant 0 : index
    %c0_38 = arith.constant 0 : index
    %78 = vector.load %arg4[%c0_37, %c0_38] : memref<2x128xf32, #tpu.memory_space<vmem>>, vector<2x128xf32>
    %79 = tpu.concatenate %74, %77 in 0 : vector<1x128xf32>, vector<1x128xf32> -> vector<2x128xf32>
    %80 = arith.addf %78, %79 : vector<2x128xf32>
    %c0_39 = arith.constant 0 : index
    %c0_40 = arith.constant 0 : index
    %81 = vector.load %arg4[%c0_39, %c0_40] : memref<2x128xf32, #tpu.memory_space<vmem>>, vector<2x128xf32>
    tpu.vector_store %arg4[%c0_39, %c0_40], %80 {strides = array<i32>} : memref<2x128xf32, #tpu.memory_space<vmem>>, vector<2x128xf32>,
    return
  }
  func.func @transform_0(%arg0: i32) -> (i32, i32, i32, i32) {
    %c0_i32 = arith.constant 0 : i32
    %c0_i32_0 = arith.constant 0 : i32
    %c0_i32_1 = arith.constant 0 : i32
    %c0_i32_2 = arith.constant 0 : i32
    return %arg0, %c0_i32, %c0_i32_0, %c0_i32_1 : i32, i32, i32, i32
  }
  func.func @transform_1(%arg0: i32) -> (i32, i32, i32) {
    %c0_i32 = arith.constant 0 : i32
    %c0_i32_0 = arith.constant 0 : i32
    %c0_i32_1 = arith.constant 0 : i32
    %c0_i32_2 = arith.constant 0 : i32
    return %c0_i32, %c0_i32_0, %c0_i32_1 : i32, i32, i32
  }
  func.func @transform_2(%arg0: i32) -> (i32, i32, i32) {
    %c0_i32 = arith.constant 0 : i32
    %c0_i32_0 = arith.constant 0 : i32
    %c0_i32_1 = arith.constant 0 : i32
    return %arg0, %c0_i32, %c0_i32_0 : i32, i32, i32
  }
  func.func @transform_3(%arg0: i32) -> (i32, i32) {
    %c0_i32 = arith.constant 0 : i32
    %c0_i32_0 = arith.constant 0 : i32
    %c0_i32_1 = arith.constant 0 : i32
    return %c0_i32, %c0_i32_0 : i32, i32
  }
}

module attributes {stable_mosaic.version = 11 : i64} {
  func.func @kernel(%arg0: i32, %arg1: memref<1x64x128xf32, #tpu.memory_space<vmem>>, %arg2: memref<2x128xf32, #tpu.memory_space<vmem>>, %arg3: memref<1x128xf32, #tpu.memory_space<vmem>>, %arg4: memref<1x128xf32, #tpu.memory_space<vmem>>, %arg5: memref<128x128xf32, #tpu.memory_space<vmem>>, %arg6: memref<1x128xf32, #tpu.memory_space<vmem>>, %arg7: memref<1x1x128xf32, #tpu.memory_space<vmem>>) attributes {dimension_semantics = [#tpu.dimension_semantics<parallel>], iteration_bounds = array<i64: 2>, scalar_prefetch = 0 : i64, scratch_operands = 0 : i64, tpu.core_type = #tpu.core_type<tc>, window_params = [{transform_indices = @transform_0, window_bounds = array<i64: 1, 64, 128>}, {pipeline_mode = #tpu.pipeline_mode<synchronous>, transform_indices = @transform_1, window_bounds = array<i64: 2, 128>}, {pipeline_mode = #tpu.pipeline_mode<synchronous>, transform_indices = @transform_2, window_bounds = array<i64: 1, 128>}, {pipeline_mode = #tpu.pipeline_mode<synchronous>, transform_indices = @transform_3, window_bounds = array<i64: 1, 128>}, {pipeline_mode = #tpu.pipeline_mode<synchronous>, transform_indices = @transform_4, window_bounds = array<i64: 128, 128>}, {pipeline_mode = #tpu.pipeline_mode<synchronous>, transform_indices = @transform_5, window_bounds = array<i64: 1, 128>}, {transform_indices = @transform_6, window_bounds = array<i64: 1, 1, 128>}]} {
    %c0 = arith.constant 0 : index
    %c0_0 = arith.constant 0 : index
    %0 = vector.load %arg2[%c0, %c0_0] : memref<2x128xf32, #tpu.memory_space<vmem>>, vector<2x128xf32>
    %1 = vector.extract_strided_slice %0 {offsets = [0, 0], sizes = [1, 128], strides = [1, 1]} : vector<2x128xf32> to vector<1x128xf32>
    %cst = arith.constant 7.812500e-03 : f32
    %2 = vector.broadcast %cst : f32 to vector<1x128xf32>
    %3 = arith.mulf %1, %2 : vector<1x128xf32>
    %4 = vector.extract_strided_slice %0 {offsets = [1, 0], sizes = [1, 128], strides = [1, 1]} : vector<2x128xf32> to vector<1x128xf32>
    %cst_1 = arith.constant 7.812500e-03 : f32
    %5 = vector.broadcast %cst_1 : f32 to vector<1x128xf32>
    %6 = arith.mulf %4, %5 : vector<1x128xf32>
    %7 = arith.mulf %3, %3 : vector<1x128xf32>
    %8 = arith.subf %6, %7 : vector<1x128xf32>
    %cst_2 = arith.constant 0.000000e+00 : f32
    %9 = vector.broadcast %cst_2 : f32 to vector<1x128xf32>
    %10 = arith.maximumf %8, %9 : vector<1x128xf32>
    %c0_3 = arith.constant 0 : index
    %c0_4 = arith.constant 0 : index
    %11 = vector.load %arg3[%c0_3, %c0_4] : memref<1x128xf32, #tpu.memory_space<vmem>>, vector<1x128xf32>
    %cst_5 = arith.constant 9.99999974E-6 : f32
    %12 = vector.broadcast %cst_5 : f32 to vector<1x128xf32>
    %13 = arith.addf %10, %12 : vector<1x128xf32>
    %14 = math.rsqrt %13 : vector<1x128xf32>
    %15 = arith.mulf %11, %14 : vector<1x128xf32>
    %c0_6 = arith.constant 0 : index
    %c0_7 = arith.constant 0 : index
    %16 = vector.load %arg4[%c0_6, %c0_7] : memref<1x128xf32, #tpu.memory_space<vmem>>, vector<1x128xf32>
    %17 = arith.mulf %3, %15 : vector<1x128xf32>
    %18 = arith.subf %16, %17 : vector<1x128xf32>
    %c0_8 = arith.constant 0 : index
    %c0_9 = arith.constant 0 : index
    %c0_10 = arith.constant 0 : index
    %19 = vector.load %arg1[%c0_8, %c0_9, %c0_10] : memref<1x64x128xf32, #tpu.memory_space<vmem>>, vector<1x64x128xf32>
    %20 = vector.shape_cast %19 : vector<1x64x128xf32> to vector<64x128xf32>
    %21 = vector.broadcast %15 : vector<1x128xf32> to vector<64x128xf32>
    %22 = arith.mulf %20, %21 : vector<64x128xf32>
    %23 = vector.broadcast %18 : vector<1x128xf32> to vector<64x128xf32>
    %24 = arith.addf %22, %23 : vector<64x128xf32>
    %cst_11 = arith.constant 0.000000e+00 : f32
    %25 = vector.broadcast %cst_11 : f32 to vector<64x128xf32>
    %26 = arith.maximumf %24, %25 : vector<64x128xf32>
    %cst_12 = arith.constant dense<0.000000e+00> : vector<128xf32>
    %27 = vector.multi_reduction <add>, %26, %cst_12 [0] : vector<64x128xf32> to vector<128xf32>
    %28 = vector.shape_cast %27 : vector<128xf32> to vector<1x128xf32>
    %cst_13 = arith.constant 1.562500e-02 : f32
    %29 = vector.broadcast %cst_13 : f32 to vector<1x128xf32>
    %30 = arith.mulf %28, %29 : vector<1x128xf32>
    %c0_14 = arith.constant 0 : index
    %c0_15 = arith.constant 0 : index
    %31 = vector.load %arg5[%c0_14, %c0_15] : memref<128x128xf32, #tpu.memory_space<vmem>>, vector<128x128xf32>
    %cst_16 = arith.constant dense<0.000000e+00> : vector<1x128xf32>
    %32 = tpu.matmul %30, %31, %cst_16 {dimension_numbers = #tpu.dot_dimension_numbers<[1], [0], [0], [1], [0, 0, 1, 1], [], []>} : vector<1x128xf32>, vector<128x128xf32>, vector<1x128xf32> -> vector<1x128xf32>
    %c0_17 = arith.constant 0 : index
    %c0_18 = arith.constant 0 : index
    %33 = vector.load %arg6[%c0_17, %c0_18] : memref<1x128xf32, #tpu.memory_space<vmem>>, vector<1x128xf32>
    %34 = arith.addf %32, %33 : vector<1x128xf32>
    %c0_19 = arith.constant 0 : index
    %c0_20 = arith.constant 0 : index
    %c0_21 = arith.constant 0 : index
    %35 = vector.load %arg7[%c0_19, %c0_20, %c0_21] : memref<1x1x128xf32, #tpu.memory_space<vmem>>, vector<1x1x128xf32>
    %36 = vector.shape_cast %35 : vector<1x1x128xf32> to vector<1x128xf32>
    %37 = vector.shape_cast %34 : vector<1x128xf32> to vector<1x1x128xf32>
    tpu.vector_store %arg7[%c0_19, %c0_20, %c0_21], %37 {strides = array<i32>} : memref<1x1x128xf32, #tpu.memory_space<vmem>>, vector<1x1x128xf32>,
    return
  }
  func.func @transform_0(%arg0: i32) -> (i32, i32, i32) {
    %c0_i32 = arith.constant 0 : i32
    %c0_i32_0 = arith.constant 0 : i32
    %c0_i32_1 = arith.constant 0 : i32
    return %arg0, %c0_i32, %c0_i32_0 : i32, i32, i32
  }
  func.func @transform_1(%arg0: i32) -> (i32, i32) {
    %c0_i32 = arith.constant 0 : i32
    %c0_i32_0 = arith.constant 0 : i32
    %c0_i32_1 = arith.constant 0 : i32
    return %c0_i32, %c0_i32_0 : i32, i32
  }
  func.func @transform_2(%arg0: i32) -> (i32, i32) {
    %c0_i32 = arith.constant 0 : i32
    %c0_i32_0 = arith.constant 0 : i32
    %c0_i32_1 = arith.constant 0 : i32
    return %c0_i32, %c0_i32_0 : i32, i32
  }
  func.func @transform_3(%arg0: i32) -> (i32, i32) {
    %c0_i32 = arith.constant 0 : i32
    %c0_i32_0 = arith.constant 0 : i32
    %c0_i32_1 = arith.constant 0 : i32
    return %c0_i32, %c0_i32_0 : i32, i32
  }
  func.func @transform_4(%arg0: i32) -> (i32, i32) {
    %c0_i32 = arith.constant 0 : i32
    %c0_i32_0 = arith.constant 0 : i32
    %c0_i32_1 = arith.constant 0 : i32
    return %c0_i32, %c0_i32_0 : i32, i32
  }
  func.func @transform_5(%arg0: i32) -> (i32, i32) {
    %c0_i32 = arith.constant 0 : i32
    %c0_i32_0 = arith.constant 0 : i32
    %c0_i32_1 = arith.constant 0 : i32
    return %c0_i32, %c0_i32_0 : i32, i32
  }
  func.func @transform_6(%arg0: i32) -> (i32, i32, i32) {
    %c0_i32 = arith.constant 0 : i32
    %c0_i32_0 = arith.constant 0 : i32
    %c0_i32_1 = arith.constant 0 : i32
    return %arg0, %c0_i32, %c0_i32_0 : i32, i32, i32
  }
}

</mosaic_0001>

<bundles_post_ra>
// kernel: simplenet_forward.7
= control target key start
LH: loop header
LB: loop body
LE: loop exit
PB: predicated region body
PF: predicated region fallthrough
CT: control target
= control target key end

     0   :  { %s466_s15 = smov 0   ;;  %s496_s0 = inlined_call_operand.vmem [shape: f32[2,64,128], index: 0, kind: input, shape index: {}]   ;;  %s497_s1 = inlined_call_operand.vmem [shape: f32[2,128], index: 1, kind: input, shape index: {}]   ;;  %s498_s2 = inlined_call_operand.vmem [shape: f32[1,128], index: 2, kind: input, shape index: {}]   ;;  %s499_s3 = inlined_call_operand.vmem [shape: f32[1,128], index: 3, kind: input, shape index: {}]   ;;  %s500_s4 = inlined_call_operand.vmem [shape: bf16[2,64,128], index: 4, kind: output, shape index: {}]  }
   0x1 LB: > { %s369_s16 = sadd.s32 4294967295, %s438_s15   ;;  %p373_p0 = scmp.ge.s32.totalorder %s438_s15, 1  ;;  %s438_s15 = sphi %s466_s15, %s14_s15  }
   0x2   : > { %p162_p1 = scmp.lt.s32.totalorder %s438_s15, 3 }
   0x4   : > { %p163_p2 = pnand %p373_p0, %p162_p1 }
   0x5   : > { %v198_v0 = vld [vmem:[%s497_s1] sm:$0x3] (!%p163_p2)  ;;  %v440_v7 = vmov (!%p163_p2), 1966171168   ;;  %v213_v9 = vlaneseq (!%p163_p2)  ;;  %p188_p3 = scmp.lt.s32.totalorder (!%p163_p2), %s369_s16, 1 }
   0x6   : > { %166 = sbr.rel (%p163_p2) target bundleno = 51 (0x33), region = 36  ;;  %v199_v1 = vmul.f32 (!%p163_p2), 0.0078125, %v198_v0  ;;  %v211_v8 = vunpack.c.l.s4 (!%p163_p2), %v440_v7  ;;  %v206_v16 = vld [vmem:[%s498_s2] sm:$0x1] (!%p163_p2) }
   0x7   : > { %v214_v11 = vshrl.u32 (!%p163_p2), %v213_v9, 7  ;;  %v227_v20 = vld [vmem:[%s499_s3] sm:$0x1] (!%p163_p2) }
   0x8   : > { %v200_v2 = vmul.f32 (!%p163_p2), %v199_v1, %v199_v1  ;;  %v212_v10 = vunpack.c.0.s8 (!%p163_p2), %v211_v8 }
   0x9   : > { %v241_v18 = vsub.s32 (!%p163_p2), 0, %v214_v11 }
   0xa   : > { %v202_v3 = vrot.slane (!%p163_p2), %v200_v2, 7  ;;  %v215_v12 = vsub.s32 (!%p163_p2), %v212_v10, %v214_v11 }
   0xc   : > { %v204_v4 = vsub.f32 (!%p163_p2), %v199_v1, %v202_v3 }
   0xd   : > { %s502_s16 = smov (!%p188_p3, %s369_s16), 1 }
   0xe   : > { %v205_v5 = vmax.f32 %v204_v4, 0.0  ;;  %s388_s19 = sshll.u32 %s502_s16, 6  ;;  %s389_s27 = sshll.u32 %s502_s16, 5 }
   0xf   : > { %s192_s22 = scalar_lea.vmem %s496_s0, %s388_s19  ;;  %s197_s30 = scalar_lea.vmem %s500_s4, %s389_s27 }
  0x10   : > { %v207_v6 = vadd.f32 1e-05, %v205_v5  ;;  %v230_v21 = vld [vmem:[%s192_s22] sm:$0xff]  ;;  %v231_v22 = vld [vmem:[%s192_s22 + $0x8] sm:$0xff]  ;;  %v232_v23 = vld [vmem:[%s192_s22 + $0x10] sm:$0xff] }
  0x11   : > { %v233_v24 = vld [vmem:[%s192_s22 + $0x18] sm:$0xff]  ;;  %v234_v27 = vld [vmem:[%s192_s22 + $0x20] sm:$0xff]  ;;  %v235_v28 = vld [vmem:[%s192_s22 + $0x28] sm:$0xff] }
  0x12   : > { %430 = vrsqrt.f32 %v207_v6  ;;  %v236_v29 = vld [vmem:[%s192_s22 + $0x30] sm:$0xff]  ;;  %v237_v30 = vld [vmem:[%s192_s22 + $0x38] sm:$0xff] }
  0x1c   : > { %v431_v13 = vpop.eup %430 }
  0x1d   : > { %v216_v14 = vrot.slane %v431_v13, %v215_v12 }
  0x1f   : > { %v217_v15 = vcombine.high %v216_v14, %v216_v14 }
  0x21   : > { %v224_v17 = vrot.slane %v217_v15, %v215_v12 }
  0x23   : > { %v226_v19 = vmul.f32 %v224_v17, %v206_v16 }
  0x25   : > { %v228_v25 = vmul.f32 %v226_v19, %v199_v1  ;;  %v242_v26 = vrot.slane %v226_v19, %v241_v18 }
  0x27   : > { %v229_v31 = vsub.f32 %v227_v20, %v228_v25  ;;  %v244_v32 = vmul.f32 %v242_v26, %v230_v21  ;;  %v245_v33 = vmul.f32 %v242_v26, %v231_v22  ;;  %v246_v34 = vmul.f32 %v242_v26, %v232_v23 }
  0x28   : > { %v247_v35 = vmul.f32 %v242_v26, %v233_v24  ;;  %v248_v36 = vmul.f32 %v242_v26, %v234_v27  ;;  %v249_v37 = vmul.f32 %v242_v26, %v235_v28  ;;  %v250_v38 = vmul.f32 %v242_v26, %v236_v29 }
  0x29   : > { %v256_v39 = vrot.slane %v229_v31, %v241_v18  ;;  %v251_v40 = vmul.f32 %v242_v26, %v237_v30 }
  0x2b   : > { %v258_v41 = vadd.f32 %v256_v39, %v244_v32  ;;  %v259_v42 = vadd.f32 %v256_v39, %v245_v33  ;;  %v260_v43 = vadd.f32 %v256_v39, %v246_v34  ;;  %v261_v44 = vadd.f32 %v256_v39, %v247_v35 }
  0x2c   : > { %v262_v45 = vadd.f32 %v256_v39, %v248_v36  ;;  %v263_v46 = vadd.f32 %v256_v39, %v249_v37  ;;  %v264_v47 = vadd.f32 %v256_v39, %v250_v38  ;;  %v265_v48 = vadd.f32 %v256_v39, %v251_v40 }
  0x2d   : > { %v266_v49 = vmax.f32 %v258_v41, 0.0  ;;  %v267_v50 = vmax.f32 %v259_v42, 0.0  ;;  %v268_v51 = vmax.f32 %v260_v43, 0.0  ;;  %v269_v52 = vmax.f32 %v261_v44, 0.0 }
  0x2e   : > { %v270_v53 = vmax.f32 %v262_v45, 0.0  ;;  %v271_v54 = vmax.f32 %v263_v46, 0.0  ;;  %v272_v55 = vmax.f32 %v264_v47, 0.0  ;;  %v273_v56 = vmax.f32 %v265_v48, 0.0 }
  0x2f   : > { %v401_v57 = vpack.c.bf16 %v267_v50, %v266_v49  ;;  %v406_v58 = vpack.c.bf16 %v269_v52, %v268_v51 }
  0x30   : > { %v411_v59 = vpack.c.bf16 %v271_v54, %v270_v53  ;;  %v416_v60 = vpack.c.bf16 %v273_v56, %v272_v55 }
  0x31   : > { %402 = vst [vmem:[%s197_s30] sm:$0xff] %v401_v57   ;;  %418 = vst [vmem:[%s197_s30 + $0x8] sm:$0xff] %v406_v58  }
  0x32   : > { %419 = vst [vmem:[%s197_s30 + $0x10] sm:$0xff] %v411_v59   ;;  %420 = vst [vmem:[%s197_s30 + $0x18] sm:$0xff] %v416_v60  }
  0x33 PF: > { %s14_s15 = sadd.s32 1, %s438_s15  }
  0x34   : > { %p11_p4 = scmp.ge.s32.totalorder %s14_s15, 4  }
  0x36   :  { %13 = sbr.rel (!%p11_p4) target bundleno = 1 (0x1), region = 66 }

// kernel: simplenet_forward.6
= control target key start
LH: loop header
LB: loop body
LE: loop exit
PB: predicated region body
PF: predicated region fallthrough
CT: control target
= control target key end

     0   :  { %s1027_s12 = smov 0   ;;  %s1496_s0 = inlined_call_operand.vmem [shape: f32[2,10,10,1], index: 0, kind: input, shape index: {}]   ;;  %s1497_s1 = inlined_call_operand.vmem [shape: f32[9,1,128], index: 1, kind: input, shape index: {}]   ;;  %s1498_s2 = inlined_call_operand.vmem [shape: f32[2,64,128], index: 2, kind: output, shape index: {0}]   ;;  %s1499_s3 = inlined_call_operand.vmem [shape: f32[2,128], index: 3, kind: output, shape index: {1}]  }
   0x1 LB: > { %s955_s13 = sadd.s32 4294967295, %s1003_s12   ;;  %p959_p0 = scmp.ge.s32.totalorder %s1003_s12, 1  ;;  %s1003_s12 = sphi %s1027_s12, %s14_s12  }
   0x2   : > { %p135_p1 = scmp.lt.s32.totalorder %s1003_s12, 3 }
   0x4   : > { %p136_p2 = pnand %p959_p0, %p135_p1 }
   0x6   : > { %139 = sbr.rel (%p136_p2) target bundleno = 266 (0x10a), region = 28 }
   0xd   : > { %p159_p3 = scmp.lt.s32.totalorder %s955_s13, 1  ;;  %p963_p4 = scmp.ne.s32.totalorder %s955_s13, 0 }
   0xe   : > { %v1005_v0 = vmov (!%p963_p4), 0.0  }
   0xf   : > { %s160_s14 = scalar_select %p159_p3, %s955_s13, 1 }
  0x10   : > { %172 = sbr.rel (%p963_p4) target bundleno = 23 (0x17), region = 32  ;;  %173 = vst [vmem:[%s1499_s3] sm:$0x3] (!%p963_p4), %v1005_v0 }
  0x11   : > { %s984_s15 = smul.u32 160, %s160_s14  ;;  %s983_s16 = sshll.u32 %s160_s14, 6 }
  0x12   : > { %s1038_s19 = scalar_lea.vmem %s1498_s2, %s983_s16 }
  0x13   : > { %s1043_s22 = scalar_lea.vmem %s1496_s0, %s984_s15 }
  0x17 PF: > { %v175_v1 = vld [vmem:[%s1043_s22 + $0x8] sm:$0x3]  ;;  %v174_v2 = vld [vmem:[%s1043_s22] sm:$0xff]  ;;  %v1006_v3 = vmov 0   ;;  %v177_v4 = vld [vmem:[%s1043_s22 + $0x18] sm:$0x3] }
  0x18   : > { %996 = vset.pattern.permute.xlu1 %v1006_v3  ;;  %995 = vset.pattern.permute.xlu0 %v1006_v3  ;;  %v176_v5 = vld [vmem:[%s1043_s22 + $0x10] sm:$0xff]  ;;  %v179_v6 = vld [vmem:[%s1043_s22 + $0x28] sm:$0x3]  ;;  %v178_v7 = vld [vmem:[%s1043_s22 + $0x20] sm:$0xff]  ;;  %vm337_vm0 = vcmask 1046528   ;;  %vm418_vm1 = vcmask 1045504  }
  0x19   : > { %261 = vperm.xlu1 %996, %v175_v1   ;;  %197 = vperm.xlu0 %995, %v174_v2   ;;  %v181_v8 = vld [vmem:[%s1043_s22 + $0x38] sm:$0x3]  ;;  %v180_v9 = vld [vmem:[%s1043_s22 + $0x30] sm:$0xff]  ;;  %v183_v10 = vld [vmem:[%s1043_s22 + $0x48] sm:$0x3]  ;;  %vm890_vm2 = vcmask 1040384  }
  0x1a   : > { %v182_v11 = vld [vmem:[%s1043_s22 + $0x40] sm:$0xff]  ;;  %v185_v12 = vld [vmem:[%s1043_s22 + $0x58] sm:$0x3]  ;;  %v184_v13 = vld [vmem:[%s1043_s22 + $0x50] sm:$0xff] }
  0x1b   : > { %v187_v14 = vld [vmem:[%s1043_s22 + $0x68] sm:$0x3]  ;;  %v186_v15 = vld [vmem:[%s1043_s22 + $0x60] sm:$0xff]  ;;  %v189_v16 = vld [vmem:[%s1043_s22 + $0x78] sm:$0x3] }
  0x1c   : > { %v188_v17 = vld [vmem:[%s1043_s22 + $0x70] sm:$0xff]  ;;  %v191_v18 = vld [vmem:[%s1043_s22 + $0x88] sm:$0x3]  ;;  %v190_v19 = vld [vmem:[%s1043_s22 + $0x80] sm:$0xff] }
  0x1d   : > { %266 = vperm.xlu1 %996, %v177_v4   ;;  %202 = vperm.xlu0 %995, %v176_v5   ;;  %v193_v20 = vld [vmem:[%s1043_s22 + $0x98] sm:$0x3]  ;;  %v192_v21 = vld [vmem:[%s1043_s22 + $0x90] sm:$0xff]  ;;  %v1071_v22 = vld [vmem:[%s1497_s1 + $0x1] ss:$0 sm:$0xff] }
  0x1e   : > { %v1076_v23 = vld [vmem:[%s1497_s1 + $0x2] ss:$0 sm:$0xff]  ;;  %v1083_v28 = vld [vmem:[%s1497_s1] ss:$0 sm:$0xff]  ;;  %v1090_v31 = vld [vmem:[%s1497_s1 + $0x4] ss:$0 sm:$0xff] }
  0x1f   : > { %v1095_v35 = vld [vmem:[%s1497_s1 + $0x5] ss:$0 sm:$0xff]  ;;  %v1105_v44 = vld [vmem:[%s1497_s1 + $0x3] ss:$0 sm:$0xff]  ;;  %v1119_v63 = vld [vmem:[%s1497_s1 + $0x7] ss:$0 sm:$0xff] }
  0x20   : > { %v1127_v5 = vld [vmem:[%s1497_s1 + $0x8] ss:$0 sm:$0xff] }
  0x21   : > { %271 = vperm.xlu1 %996, %v179_v6   ;;  %207 = vperm.xlu0 %995, %v178_v7   ;;  %1505 = vst [vmem:[#allocation2_spill] sm:$0xff] %v1127_v5 }
  0x25   : > { %276 = vperm.xlu1 %996, %v181_v8   ;;  %212 = vperm.xlu0 %995, %v180_v9  }
  0x29   : > { %281 = vperm.xlu1 %996, %v183_v10   ;;  %217 = vperm.xlu0 %995, %v182_v11  }
  0x2d   : > { %286 = vperm.xlu1 %996, %v185_v12   ;;  %222 = vperm.xlu0 %995, %v184_v13  }
  0x31   : > { %291 = vperm.xlu1 %996, %v187_v14   ;;  %227 = vperm.xlu0 %995, %v186_v15  }
  0x35   : > { %296 = vperm.xlu1 %996, %v189_v16   ;;  %232 = vperm.xlu0 %995, %v188_v17  }
  0x39   : > { %492 = vperm.xlu1 %996, %v191_v18   ;;  %463 = vperm.xlu0 %995, %v190_v19  }
  0x3d   : > { %686 = vperm.xlu1 %996, %v193_v20   ;;  %657 = vperm.xlu0 %995, %v192_v21  }
  0x98   : > { %v262_v24 = vpop.permute.xlu1 %261  ;;  %v198_v25 = vpop.permute.xlu0 %197 }
  0x99   : > { %v306_v26 = vmul.f32 %v1071_v22, %v262_v24  ;;  %v387_v27 = vmul.f32 %v1076_v23, %v262_v24  ;;  %v305_v29 = vmul.f32 %v1071_v22, %v198_v25  ;;  %v386_v30 = vmul.f32 %v1076_v23, %v198_v25 }
  0x9a   : > { %v241_v36 = vmul.f32 %v1083_v28, %v198_v25 }
  0x9b   : > { %v339_v32 = vrot.slane %v306_v26, 1  ;;  %v420_v33 = vrot.slane %v387_v27, 2  ;;  %v338_v34 = vrot.slane %v305_v29, 1  ;;  %v419_v37 = vrot.slane %v386_v30, 2 }
  0x9c   : > { %v267_v38 = vpop.permute.xlu1 %266  ;;  %v203_v39 = vpop.permute.xlu0 %202 }
  0x9d   : > { %v340_v40 = vsel %vm337_vm0, %v338_v34, %v339_v32  ;;  %v308_v41 = vmul.f32 %v1071_v22, %v267_v38  ;;  %v389_v42 = vmul.f32 %v1076_v23, %v267_v38  ;;  %v502_v43 = vmul.f32 %v1090_v31, %v267_v38 }
  0x9e   : > { %v370_v45 = vadd.f32 %v340_v40, %v241_v36  ;;  %v421_v46 = vsel %vm418_vm1, %v419_v37, %v420_v33  ;;  %v582_v47 = vmul.f32 %v1095_v35, %v267_v38  ;;  %v242_v50 = vmul.f32 %v1083_v28, %v203_v39 }
  0x9f   : > { %v342_v48 = vrot.slane %v308_v41, 1  ;;  %v423_v49 = vrot.slane %v389_v42, 2  ;;  %v307_v51 = vmul.f32 %v1071_v22, %v203_v39  ;;  %v534_v53 = vrot.slane %v502_v43, 1 }
  0xa0   : > { %v451_v52 = vadd.f32 %v421_v46, %v370_v45  ;;  %v388_v54 = vmul.f32 %v1076_v23, %v203_v39  ;;  %v472_v55 = vmul.f32 %v1105_v44, %v203_v39  ;;  %v272_v56 = vpop.permute.xlu1 %271  ;;  %v501_v58 = vmul.f32 %v1090_v31, %v203_v39  ;;  %v1130_v10 = vpop.permute.xlu0 %207 }
  0xa1   : > { %v341_v57 = vrot.slane %v307_v51, 1  ;;  %v581_v59 = vmul.f32 %v1095_v35, %v203_v39  ;;  %v310_v60 = vmul.f32 %v1071_v22, %v272_v56  ;;  %v391_v0 = vmul.f32 %v1076_v23, %v272_v56 }
  0xa2   : > { %v422_v61 = vrot.slane %v388_v54, 2  ;;  %v480_v62 = vadd.f32 %v472_v55, %v451_v52  ;;  %v504_v1 = vmul.f32 %v1090_v31, %v272_v56  ;;  %v614_v2 = vrot.slane %v582_v47, 2 }
  0xa3   : > { %v343_v3 = vsel %vm337_vm0, %v341_v57, %v342_v48  ;;  %v533_v4 = vrot.slane %v501_v58, 1  ;;  %v613_v8 = vrot.slane %v581_v59, 2  ;;  %v345_v9 = vrot.slane %v310_v60, 1 }
  0xa4   : > { %v371_v6 = vadd.f32 %v343_v3, %v242_v50  ;;  %v424_v7 = vsel %vm418_vm1, %v422_v61, %v423_v49  ;;  %v426_v12 = vrot.slane %v391_v0, 2  ;;  %v584_v13 = vmul.f32 %v1095_v35, %v272_v56  ;;  %v277_v25 = vpop.permute.xlu1 %276 }
  0xa5   : > { %v535_v11 = vsel %vm337_vm0, %v533_v4, %v534_v53  ;;  %v696_v14 = vmul.f32 %v1119_v63, %v272_v56  ;;  %v537_v17 = vrot.slane %v504_v1, 1  ;;  %v776_v18 = vmul.f32 %v1127_v5, %v272_v56  ;;  %v1159_v53 = vpop.permute.xlu0 %212 }
  0xa6   : > { %v452_v15 = vadd.f32 %v424_v7, %v371_v6  ;;  %v565_v16 = vadd.f32 %v535_v11, %v480_v62  ;;  %v617_v19 = vrot.slane %v584_v13, 2  ;;  %v243_v20 = vmul.f32 %v1083_v28, %v1130_v10 }
  0xa7   : > { %v309_v21 = vmul.f32 %v1071_v22, %v1130_v10  ;;  %v390_v24 = vmul.f32 %v1076_v23, %v1130_v10  ;;  %v728_v26 = vrot.slane %v696_v14, 1  ;;  %v808_v27 = vrot.slane %v776_v18, 2 }
  0xa8   : > { %v473_v29 = vmul.f32 %v1105_v44, %v1130_v10  ;;  %v503_v30 = vmul.f32 %v1090_v31, %v1130_v10  ;;  %v583_v34 = vmul.f32 %v1095_v35, %v1130_v10  ;;  %v695_v36 = vmul.f32 %v1119_v63, %v1130_v10  ;;  %v282_v3 = vpop.permute.xlu1 %281 }
  0xa9   : > { %v344_v32 = vrot.slane %v309_v21, 1  ;;  %v425_v33 = vrot.slane %v390_v24, 2  ;;  %v775_v39 = vmul.f32 %v1127_v5, %v1130_v10  ;;  %v312_v40 = vmul.f32 %v1071_v22, %v277_v25 }
  0xaa   : > { %v481_v37 = vadd.f32 %v473_v29, %v452_v15  ;;  %v536_v38 = vrot.slane %v503_v30, 1  ;;  %v616_v42 = vrot.slane %v583_v34, 2  ;;  %v727_v43 = vrot.slane %v695_v36, 1  ;;  %v1196_v34 = vpop.permute.xlu0 %217 }
  0xab   : > { %v346_v41 = vsel %vm337_vm0, %v344_v32, %v345_v9  ;;  %v393_v45 = vmul.f32 %v1076_v23, %v277_v25  ;;  %v615_v46 = vsel %vm418_vm1, %v613_v8, %v614_v2  ;;  %v807_v49 = vrot.slane %v775_v39, 2 }
  0xac   : > { %v372_v47 = vadd.f32 %v346_v41, %v243_v20  ;;  %v538_v48 = vsel %vm337_vm0, %v536_v38, %v537_v17  ;;  %v1157_v50 = vadd.f32 %v615_v46, %v565_v16  ;;  %v348_v52 = vrot.slane %v312_v40, 1 }
  0xad   : > { %v566_v51 = vadd.f32 %v538_v48, %v481_v37  ;;  %v618_v54 = vsel %vm418_vm1, %v616_v42, %v617_v19  ;;  %v1163_v55 = vsel %vm337_vm0, %v727_v43, %v728_v26  ;;  %v506_v56 = vmul.f32 %v1090_v31, %v277_v25 }
  0xae   : > { %v586_v57 = vmul.f32 %v1095_v35, %v277_v25  ;;  %v1168_v58 = vsel %vm418_vm1, %v807_v49, %v808_v27  ;;  %v429_v59 = vrot.slane %v393_v45, 2  ;;  %v698_v60 = vmul.f32 %v1119_v63, %v277_v25  ;;  %v287_v49 = vpop.permute.xlu1 %286 }
  0xaf   : > { %1506 = vst [vmem:[#allocation3_spill] sm:$0xff] %v1168_v58  ;;  %v427_v61 = vsel %vm418_vm1, %v425_v33, %v426_v12  ;;  %v540_v62 = vrot.slane %v506_v56, 1  ;;  %v778_v0 = vmul.f32 %v1127_v5, %v277_v25  ;;  %v244_v2 = vmul.f32 %v1083_v28, %v1159_v53 }
  0xb0   : > { %v453_v1 = vadd.f32 %v427_v61, %v372_v47  ;;  %v620_v4 = vrot.slane %v586_v57, 2  ;;  %v311_v6 = vmul.f32 %v1071_v22, %v1159_v53  ;;  %v392_v7 = vmul.f32 %v1076_v23, %v1159_v53 }
  0xb1   : > { %v474_v8 = vmul.f32 %v1105_v44, %v1159_v53  ;;  %v505_v9 = vmul.f32 %v1090_v31, %v1159_v53  ;;  %v585_v11 = vmul.f32 %v1095_v35, %v1159_v53  ;;  %v697_v12 = vmul.f32 %v1119_v63, %v1159_v53 }
  0xb2   : > { %v777_v13 = vmul.f32 %v1127_v5, %v1159_v53  ;;  %v731_v14 = vrot.slane %v698_v60, 1  ;;  %v347_v15 = vrot.slane %v311_v6, 1  ;;  %v314_v17 = vmul.f32 %v1071_v22, %v282_v3 }
  0xb3   : > { %v482_v16 = vadd.f32 %v474_v8, %v453_v1  ;;  %v428_v18 = vrot.slane %v392_v7, 2  ;;  %v539_v19 = vrot.slane %v505_v9, 1  ;;  %v619_v20 = vrot.slane %v585_v11, 2 }
  0xb4   : > { %v730_v21 = vrot.slane %v697_v12, 1  ;;  %v1190_v24 = vadd.f32 %v618_v54, %v566_v51  ;;  %v349_v25 = vsel %vm337_vm0, %v347_v15, %v348_v52  ;;  %v395_v26 = vmul.f32 %v1076_v23, %v282_v3 }
  0xb5   : > { %v508_v27 = vmul.f32 %v1090_v31, %v282_v3  ;;  %v811_v29 = vrot.slane %v778_v0, 2  ;;  %v373_v30 = vadd.f32 %v349_v25, %v244_v2  ;;  %v541_v32 = vsel %vm337_vm0, %v539_v19, %v540_v62 }
  0xb6   : > { %v810_v33 = vrot.slane %v777_v13, 2  ;;  %v567_v36 = vadd.f32 %v541_v32, %v482_v16  ;;  %v621_v37 = vsel %vm418_vm1, %v619_v20, %v620_v4  ;;  %v1200_v38 = vsel %vm337_vm0, %v730_v21, %v731_v14  ;;  %v1239_v21 = vpop.permute.xlu0 %222 }
  0xb7   : > { %v351_v39 = vrot.slane %v314_v17, 1  ;;  %v432_v40 = vrot.slane %v395_v26, 2  ;;  %v588_v41 = vmul.f32 %v1095_v35, %v282_v3  ;;  %v700_v42 = vmul.f32 %v1119_v63, %v282_v3 }
  0xb8   : > { %v430_v43 = vsel %vm418_vm1, %v428_v18, %v429_v59  ;;  %v543_v45 = vrot.slane %v508_v27, 1  ;;  %v1206_v46 = vmul.f32 %v1127_v5, %v282_v3  ;;  %v313_v48 = vmul.f32 %v1071_v22, %v1196_v34 }
  0xb9   : > { %v454_v47 = vadd.f32 %v430_v43, %v373_v30  ;;  %v623_v51 = vrot.slane %v588_v41, 2  ;;  %v734_v52 = vrot.slane %v700_v42, 1  ;;  %v245_v54 = vmul.f32 %v1083_v28, %v1196_v34 }
  0xba   : > { %v394_v56 = vmul.f32 %v1076_v23, %v1196_v34  ;;  %v350_v57 = vrot.slane %v313_v48, 1  ;;  %v475_v59 = vmul.f32 %v1105_v44, %v1196_v34  ;;  %v507_v60 = vmul.f32 %v1090_v31, %v1196_v34 }
  0xbb   : > { %v587_v61 = vmul.f32 %v1095_v35, %v1196_v34  ;;  %v699_v0 = vmul.f32 %v1119_v63, %v1196_v34  ;;  %v1224_v1 = vmul.f32 %v1127_v5, %v1196_v34  ;;  %v316_v2 = vmul.f32 %v1071_v22, %v287_v49 }
  0xbc   : > { %v431_v62 = vrot.slane %v394_v56, 2  ;;  %v352_v3 = vsel %vm337_vm0, %v350_v57, %v351_v39  ;;  %v483_v4 = vadd.f32 %v475_v59, %v454_v47  ;;  %v542_v6 = vrot.slane %v507_v60, 1 }
  0xbd   : > { %v622_v7 = vrot.slane %v587_v61, 2  ;;  %v1228_v8 = vadd.f32 %v621_v37, %v567_v36  ;;  %v1231_v9 = vsel %vm418_vm1, %v810_v33, %v811_v29  ;;  %v374_v11 = vadd.f32 %v352_v3, %v245_v54  ;;  %v292_v37 = vpop.permute.xlu1 %291 }
  0xbe   : > { %1507 = vst [vmem:[#allocation4_spill] sm:$0xff] %v1231_v9  ;;  %v733_v12 = vrot.slane %v699_v0, 1  ;;  %v544_v14 = vsel %vm337_vm0, %v542_v6, %v543_v45  ;;  %v397_v15 = vmul.f32 %v1076_v23, %v287_v49  ;;  %v510_v16 = vmul.f32 %v1090_v31, %v287_v49 }
  0xbf   : > { %v568_v17 = vadd.f32 %v544_v14, %v483_v4  ;;  %v354_v19 = vrot.slane %v316_v2, 1  ;;  %v590_v20 = vmul.f32 %v1095_v35, %v287_v49  ;;  %v624_v25 = vsel %vm418_vm1, %v622_v7, %v623_v51 }
  0xc0   : > { %v1243_v26 = vsel %vm337_vm0, %v733_v12, %v734_v52  ;;  %v1246_v27 = vmul.f32 %v1119_v63, %v287_v49  ;;  %v433_v29 = vsel %vm418_vm1, %v431_v62, %v432_v40  ;;  %v435_v30 = vrot.slane %v397_v15, 2 }
  0xc1   : > { %v546_v32 = vrot.slane %v510_v16, 1  ;;  %v1250_v33 = vmul.f32 %v1127_v5, %v287_v49  ;;  %v455_v36 = vadd.f32 %v433_v29, %v374_v11  ;;  %v1252_v39 = vadd.f32 %v624_v25, %v568_v17  ;;  %v1286_v11 = vpop.permute.xlu0 %227  ;;  %v297_v29 = vpop.permute.xlu1 %296 }
  0xc2   : > { %v626_v41 = vrot.slane %v590_v20, 2  ;;  %v315_v42 = vmul.f32 %v1071_v22, %v1239_v21  ;;  %v396_v43 = vmul.f32 %v1076_v23, %v1239_v21  ;;  %v476_v45 = vmul.f32 %v1105_v44, %v1239_v21 }
  0xc3   : > { %v509_v40 = vmul.f32 %v1090_v31, %v1239_v21  ;;  %v589_v47 = vmul.f32 %v1095_v35, %v1239_v21  ;;  %v1266_v48 = vmul.f32 %v1119_v63, %v1239_v21  ;;  %v246_v49 = vmul.f32 %v1083_v28, %v1239_v21 }
  0xc4   : > { %v353_v51 = vrot.slane %v315_v42, 1  ;;  %v1272_v52 = vmul.f32 %v1127_v5, %v1239_v21  ;;  %v1275_v54 = vmul.f32 %v1071_v22, %v292_v37  ;;  %v434_v56 = vrot.slane %v396_v43, 2 }
  0xc5   : > { %v484_v57 = vadd.f32 %v476_v45, %v455_v36  ;;  %v545_v59 = vrot.slane %v509_v40, 1  ;;  %v625_v60 = vrot.slane %v589_v47, 2  ;;  %v1281_v2 = vmul.f32 %v1076_v23, %v292_v37 }
  0xc6   : > { %v355_v0 = vsel %vm337_vm0, %v353_v51, %v354_v19  ;;  %v512_v7 = vmul.f32 %v1090_v31, %v292_v37  ;;  %v357_v15 = vrot.slane %v1275_v54, 1  ;;  %v1294_v16 = vmul.f32 %v1095_v35, %v292_v37 }
  0xc7   : > { %v375_v3 = vadd.f32 %v355_v0, %v246_v49  ;;  %v547_v12 = vsel %vm337_vm0, %v545_v59, %v546_v32  ;;  %v1290_v14 = vsel %vm418_vm1, %v625_v60, %v626_v41  ;;  %v438_v19 = vrot.slane %v1281_v2, 2  ;;  %v1333_v60 = vpop.permute.xlu0 %232 }
  0xc8   : > { %v1296_v17 = vadd.f32 %v547_v12, %v484_v57  ;;  %v1300_v20 = vmul.f32 %v1119_v63, %v292_v37  ;;  %v436_v25 = vsel %vm418_vm1, %v434_v56, %v435_v30  ;;  %v549_v36 = vrot.slane %v512_v7, 1 }
  0xc9   : > { %v1304_v32 = vmul.f32 %v1127_v5, %v292_v37  ;;  %v456_v41 = vadd.f32 %v436_v25, %v375_v3  ;;  %v317_v42 = vmul.f32 %v1071_v22, %v1286_v11  ;;  %v247_v43 = vmul.f32 %v1083_v28, %v1286_v11 }
  0xca   : > { %v398_v45 = vmul.f32 %v1076_v23, %v1286_v11  ;;  %v477_v40 = vmul.f32 %v1105_v44, %v1286_v11  ;;  %v511_v30 = vmul.f32 %v1090_v31, %v1286_v11  ;;  %v1319_v37 = vmul.f32 %v1095_v35, %v1286_v11 }
  0xcb   : > { %v1323_v49 = vmul.f32 %v1119_v63, %v1286_v11  ;;  %v1327_v51 = vmul.f32 %v1127_v5, %v1286_v11  ;;  %v1331_v59 = vmul.f32 %v1071_v22, %v297_v29  ;;  %v356_v2 = vrot.slane %v317_v42, 1  ;;  %v464_v4 = vpop.permute.xlu0 %463 }
  0xcc   : > { %v485_v56 = vadd.f32 %v477_v40, %v456_v41  ;;  %v548_v57 = vrot.slane %v511_v30, 1  ;;  %v437_v3 = vrot.slane %v398_v45, 2  ;;  %v1337_v7 = vmul.f32 %v1076_v23, %v297_v29  ;;  %v493_v40 = vpop.permute.xlu1 %492 }
  0xcd   : > { %1508 = vst [vmem:[#allocation5_spill] sm:$0xff] %v1327_v51  ;;  %v514_v6 = vmul.f32 %v1090_v31, %v297_v29  ;;  %v594_v41 = vmul.f32 %v1095_v35, %v297_v29  ;;  %v1346_v0 = vmul.f32 %v1119_v63, %v297_v29  ;;  %v1349_v42 = vmul.f32 %v1127_v5, %v297_v29 }
  0xce   : > { %v550_v30 = vsel %vm337_vm0, %v548_v57, %v549_v36  ;;  %v360_v18 = vrot.slane %v1331_v59, 1  ;;  %v1354_v13 = vmul.f32 %v1119_v63, %v1333_v60  ;;  %v1358_v25 = vmul.f32 %v1127_v5, %v1333_v60 }
  0xcf   : > { %1509 = vst [vmem:[#allocation6_spill] sm:$0xff] %v1349_v42  ;;  %v570_v45 = vadd.f32 %v550_v30, %v485_v56  ;;  %v441_v36 = vrot.slane %v1337_v7, 2  ;;  %v552_v57 = vrot.slane %v514_v6, 1  ;;  %v632_v62 = vrot.slane %v594_v41, 2 }
  0xd0   : > { %1510 = vst [vmem:[#allocation7_spill] sm:$0xff] %v1358_v25  ;;  %v516_v54 = vmul.f32 %v1090_v31, %v493_v40  ;;  %v708_v59 = vmul.f32 %v1119_v63, %v493_v40  ;;  %v788_v30 = vmul.f32 %v1127_v5, %v493_v40  ;;  %v596_v47 = vmul.f32 %v1095_v35, %v493_v40 }
  0xd1   : > { %v358_v6 = vsel %vm337_vm0, %v356_v2, %v357_v15  ;;  %v439_v29 = vsel %vm418_vm1, %v437_v3, %v438_v19  ;;  %v513_v56 = vmul.f32 %v1090_v31, %v1333_v60  ;;  %v593_v42 = vmul.f32 %v1095_v35, %v1333_v60 }
  0xd2   : > { %v555_v7 = vrot.slane %v516_v54, 1  ;;  %v746_v41 = vrot.slane %v708_v59, 1  ;;  %v376_v9 = vadd.f32 %v358_v6, %v247_v43  ;;  %v826_v58 = vrot.slane %v788_v30, 2  ;;  %v1380_v43 = vpop.permute.xlu1 %686  ;;  %v1385_v59 = vld [vmem:[%s1497_s1 + $0x6] ss:$0 sm:$0xff] }
  0xd3   : > { %v515_v61 = vmul.f32 %v1090_v31, %v464_v4  ;;  %v478_v40 = vmul.f32 %v1105_v44, %v1333_v60  ;;  %v707_v15 = vmul.f32 %v1119_v63, %v464_v4  ;;  %v787_v54 = vmul.f32 %v1127_v5, %v464_v4 }
  0xd4   : > { %v457_v51 = vadd.f32 %v439_v29, %v376_v9  ;;  %v635_v19 = vrot.slane %v596_v47, 2  ;;  %v551_v2 = vrot.slane %v513_v56, 1  ;;  %v631_v3 = vrot.slane %v593_v42, 2 }
  0xd5   : > { %v554_v30 = vrot.slane %v515_v61, 1  ;;  %v672_v9 = vmul.f32 %v1385_v59, %v464_v4  ;;  %v745_v29 = vrot.slane %v707_v15, 1  ;;  %v825_v6 = vrot.slane %v787_v54, 2 }
  0xd6   : > { %v486_v31 = vadd.f32 %v478_v40, %v457_v51  ;;  %v553_v12 = vsel %vm337_vm0, %v551_v2, %v552_v57  ;;  %v633_v5 = vsel %vm418_vm1, %v631_v3, %v632_v62  ;;  %v1392_v47 = vmul.f32 %v1119_v63, %v1380_v43 }
  0xd7   : > { %v248_v42 = vmul.f32 %v1083_v28, %v1333_v60  ;;  %v747_v25 = vsel %vm337_vm0, %v745_v29, %v746_v41  ;;  %v827_v61 = vsel %vm418_vm1, %v825_v6, %v826_v58  ;;  %v319_v51 = vmul.f32 %v1071_v22, %v1333_v60 }
  0xd8   : > { %v571_v56 = vadd.f32 %v553_v12, %v486_v31  ;;  %v400_v57 = vmul.f32 %v1076_v23, %v1333_v60  ;;  %v479_v62 = vmul.f32 %v1105_v44, %v464_v4  ;;  %v556_v40 = vsel %vm337_vm0, %v554_v30, %v555_v7 }
  0xd9   : > { %v595_v15 = vmul.f32 %v1095_v35, %v464_v4  ;;  %v359_v2 = vrot.slane %v319_v51, 1  ;;  %v1511_v28 = vrot.slane %v1294_v16, 2  ;;  %v1512_v12 = vrot.slane %v1319_v37, 2 }
  0xda   : > { %v651_v54 = vadd.f32 %v633_v5, %v571_v56  ;;  %v649_v22 = vadd.f32 %v1290_v14, %v1296_v17  ;;  %v440_v41 = vrot.slane %v400_v57, 2  ;;  %v666_v44 = vmul.f32 %v1385_v59, %v1130_v10 }
  0xdb   : > { %v630_v58 = vsel %vm418_vm1, %v1512_v12, %v1511_v28  ;;  %v634_v3 = vrot.slane %v595_v15, 2  ;;  %v361_v35 = vsel %vm337_vm0, %v359_v2, %v360_v18  ;;  %v667_v5 = vmul.f32 %v1385_v59, %v1159_v53  ;;  %v1524_v15 = vld [vmem:[#allocation5_spill] sm:$0xff]  ;;  %v1528_v12 = vld [vmem:[#allocation7_spill] sm:$0xff] }
  0xdc   : > { %v650_v23 = vadd.f32 %v630_v58, %v570_v45  ;;  %v680_v7 = vadd.f32 %v672_v9, %v651_v54  ;;  %v668_v4 = vmul.f32 %v1385_v59, %v1196_v34  ;;  %v377_v16 = vadd.f32 %v361_v35, %v248_v42  ;;  %v1530_v58 = vld [vmem:[#allocation3_spill] sm:$0xff] }
  0xdd   : > { %v442_v37 = vsel %vm418_vm1, %v440_v41, %v441_v36  ;;  %v636_v14 = vsel %vm418_vm1, %v634_v3, %v635_v19  ;;  %v669_v17 = vmul.f32 %v1385_v59, %v1239_v21  ;;  %v670_v10 = vmul.f32 %v1385_v59, %v1286_v11 }
  0xde   : > { %v765_v45 = vadd.f32 %v747_v25, %v680_v7  ;;  %v671_v18 = vmul.f32 %v1385_v59, %v1333_v60  ;;  %v674_v53 = vadd.f32 %v666_v44, %v1157_v50  ;;  %v458_v30 = vadd.f32 %v442_v37, %v377_v16  ;;  %v658_v44 = vpop.permute.xlu0 %657  ;;  %v1532_v16 = vld [vmem:[#allocation2_spill] sm:$0xff] }
  0xdf   : > { %v675_v34 = vadd.f32 %v667_v5, %v1190_v24  ;;  %v676_v36 = vadd.f32 %v668_v4, %v1228_v8  ;;  %v677_v19 = vadd.f32 %v669_v17, %v1252_v39  ;;  %v678_v9 = vadd.f32 %v670_v10, %v649_v22  ;;  %v1531_v22 = vld [vmem:[#allocation4_spill] sm:$0xff] }
  0xe0   : > { %v845_v31 = vadd.f32 %v827_v61, %v765_v45  ;;  %v679_v21 = vadd.f32 %v671_v18, %v650_v23  ;;  %v1513_v25 = vrot.slane %v1246_v27, 1  ;;  %v1514_v29 = vrot.slane %v1266_v48, 1 }
  0xe1   : > { %v487_v6 = vadd.f32 %v479_v62, %v458_v30  ;;  %v1515_v60 = vrot.slane %v1300_v20, 1  ;;  %v1516_v50 = vrot.slane %v1323_v49, 1  ;;  %v1517_v8 = vrot.slane %v1346_v0, 1 }
  0xe2   : > { %v738_v11 = vsel %vm337_vm0, %v1514_v29, %v1513_v25  ;;  %v1518_v39 = vrot.slane %v1354_v13, 1  ;;  %v759_v56 = vadd.f32 %v1163_v55, %v674_v53  ;;  %853 = vst [vmem:[%s1038_s19 + $0x30] sm:$0xff] %v845_v31  ;;  %v760_v27 = vadd.f32 %v1200_v38, %v675_v34 }
  0xe3   : > { %v741_v24 = vsel %vm337_vm0, %v1516_v50, %v1515_v60  ;;  %v761_v48 = vadd.f32 %v1243_v26, %v676_v36  ;;  %v762_v61 = vadd.f32 %v738_v11, %v677_v19  ;;  %v572_v49 = vadd.f32 %v556_v40, %v487_v6  ;;  %v1526_v40 = vld [vmem:[#allocation6_spill] sm:$0xff] }
  0xe4   : > { %v744_v42 = vsel %vm337_vm0, %v1518_v39, %v1517_v8  ;;  %v763_v20 = vadd.f32 %v741_v24, %v678_v9  ;;  %v1519_v57 = vrot.slane %v1206_v46, 2  ;;  %v1520_v0 = vrot.slane %v1224_v1, 2 }
  0xe5   : > { %v764_v51 = vadd.f32 %v744_v42, %v679_v21  ;;  %v1521_v62 = vrot.slane %v1250_v33, 2  ;;  %v1522_v55 = vrot.slane %v1272_v52, 2  ;;  %v1523_v26 = vrot.slane %v1304_v32, 2 }
  0xe6   : > { %v815_v13 = vsel %vm418_vm1, %v1520_v0, %v1519_v57  ;;  %v1525_v54 = vrot.slane %v1524_v15, 2  ;;  %v1527_v28 = vrot.slane %v1526_v40, 2  ;;  %v1529_v46 = vrot.slane %v1528_v12, 2 }
  0xe7   : > { %v818_v38 = vsel %vm418_vm1, %v1522_v55, %v1521_v62  ;;  %v839_v33 = vadd.f32 %v1530_v58, %v759_v56  ;;  %v840_v52 = vadd.f32 %v1531_v22, %v760_v27  ;;  %v652_v41 = vadd.f32 %v636_v14, %v572_v49 }
  0xe8   : > { %v821_v2 = vsel %vm418_vm1, %v1525_v54, %v1523_v26  ;;  %v824_v1 = vsel %vm418_vm1, %v1529_v46, %v1527_v28  ;;  %v841_v32 = vadd.f32 %v815_v13, %v761_v48  ;;  %v842_v3 = vadd.f32 %v818_v38, %v762_v61 }
  0xe9   : > { %v843_v23 = vadd.f32 %v821_v2, %v763_v20  ;;  %v844_v7 = vadd.f32 %v824_v1, %v764_v51  ;;  %847 = vst [vmem:[%s1038_s19] sm:$0xff] %v839_v33  ;;  %848 = vst [vmem:[%s1038_s19 + $0x8] sm:$0xff] %v840_v52  ;;  %v855_v35 = vadd.f32 %v840_v52, %v839_v33  ;;  %v749_v53 = vrot.slane %v1392_v47, 1 }
  0xea   : > { %v868_v5 = vmul.f32 %v839_v33, %v839_v33  ;;  %v869_v4 = vmul.f32 %v840_v52, %v840_v52  ;;  %v790_v37 = vmul.f32 %v1532_v16, %v1380_v43  ;;  %849 = vst [vmem:[%s1038_s19 + $0x10] sm:$0xff] %v841_v32  ;;  %850 = vst [vmem:[%s1038_s19 + $0x18] sm:$0xff] %v842_v3 }
  0xeb   : > { %851 = vst [vmem:[%s1038_s19 + $0x20] sm:$0xff] %v843_v23  ;;  %v870_v17 = vmul.f32 %v841_v32, %v841_v32  ;;  %852 = vst [vmem:[%s1038_s19 + $0x28] sm:$0xff] %v844_v7  ;;  %v856_v14 = vadd.f32 %v855_v35, %v841_v32  ;;  %v871_v45 = vmul.f32 %v842_v3, %v842_v3 }
  0xec   : > { %v876_v10 = vadd.f32 %v869_v4, %v868_v5  ;;  %v673_v18 = vmul.f32 %v1385_v59, %v658_v44  ;;  %v709_v30 = vmul.f32 %v1119_v63, %v658_v44  ;;  %v789_v34 = vmul.f32 %v1532_v16, %v658_v44 }
  0xed   : > { %v857_v36 = vadd.f32 %v856_v14, %v842_v3  ;;  %v872_v19 = vmul.f32 %v843_v23, %v843_v23  ;;  %v829_v21 = vrot.slane %v790_v37, 2  ;;  %v873_v6 = vmul.f32 %v844_v7, %v844_v7 }
  0xee   : > { %v877_v9 = vadd.f32 %v876_v10, %v870_v17  ;;  %v681_v43 = vadd.f32 %v673_v18, %v652_v41  ;;  %v748_v25 = vrot.slane %v709_v30, 1  ;;  %v828_v29 = vrot.slane %v789_v34, 2 }
  0xef   : > { %v858_v11 = vadd.f32 %v857_v36, %v843_v23  ;;  %v874_v24 = vmul.f32 %v845_v31, %v845_v31 }
  0xf0   : > { %v878_v60 = vadd.f32 %v877_v9, %v871_v45  ;;  %v750_v50 = vsel %vm337_vm0, %v748_v25, %v749_v53  ;;  %v830_v63 = vsel %vm418_vm1, %v828_v29, %v829_v21 }
  0xf1   : > { %v859_v59 = vadd.f32 %v858_v11, %v844_v7  ;;  %v766_v8 = vadd.f32 %v750_v50, %v681_v43 }
  0xf2   : > { %v879_v47 = vadd.f32 %v878_v60, %v872_v19 }
  0xf3   : > { %v860_v39 = vadd.f32 %v859_v59, %v845_v31  ;;  %v846_v56 = vadd.f32 %v830_v63, %v766_v8  ;;  %v889_v31 = vld [vmem:[%s1499_s3] sm:$0x3] }
  0xf4   : > { %v880_v42 = vadd.f32 %v879_v47, %v873_v6 }
  0xf5   : > { %854 = vst [vmem:[%s1038_s19 + $0x38] sm:$0xff] %v846_v56  ;;  %v861_v48 = vadd.f32 %v860_v39, %v846_v56  ;;  %v875_v61 = vmul.f32 %v846_v56, %v846_v56 }
  0xf6   : > { %v881_v27 = vadd.f32 %v880_v42, %v874_v24 }
  0xf7   : > { %v862_v20 = vrot.slane %v861_v48, 4 }
  0xf8   : > { %v882_v49 = vadd.f32 %v881_v27, %v875_v61 }
  0xf9   : > { %v863_v51 = vadd.f32 %v862_v20, %v861_v48 }
  0xfa   : > { %v883_v57 = vrot.slane %v882_v49, 4 }
  0xfb   : > { %v864_v0 = vrot.slane %v863_v51, 2 }
  0xfc   : > { %v884_v13 = vadd.f32 %v883_v57, %v882_v49 }
  0xfd   : > { %v865_v62 = vadd.f32 %v864_v0, %v863_v51 }
  0xfe   : > { %v885_v55 = vrot.slane %v884_v13, 2 }
  0xff   : > { %v866_v38 = vrot.slane %v865_v62, 1 }
 0x100   : > { %v886_v26 = vadd.f32 %v885_v55, %v884_v13 }
 0x101   : > { %v867_v54 = vadd.f32 %v866_v38, %v865_v62 }
 0x102   : > { %v887_v15 = vrot.slane %v886_v26, 1 }
 0x104   : > { %v888_v2 = vadd.f32 %v887_v15, %v886_v26 }
 0x106   : > { %v891_v40 = vsel %vm890_vm2, %v867_v54, %v888_v2 }
 0x107   : > { %v892_v28 = vadd.f32 %v891_v40, %v889_v31 }
 0x109   : > { %893 = vst [vmem:[%s1499_s3] sm:$0x3] %v892_v28 }
 0x10a PF: > { %s14_s12 = sadd.s32 1, %s1003_s12  }
 0x10b   : > { %p11_p5 = scmp.ge.s32.totalorder %s14_s12, 4  }
 0x10d   :  { %13 = sbr.rel (!%p11_p5) target bundleno = 1 (0x1), region = 78 }

// kernel: simplenet_forward.11
= control target key start
LH: loop header
LB: loop body
LE: loop exit
PB: predicated region body
PF: predicated region fallthrough
CT: control target
= control target key end

     0   :  { %11 = vsyncpa [#allocation3], 0  ;;  %s890_s0 = inlined_call_operand.vmem [shape: f32[2,64,128], index: 0, kind: input, shape index: {}]   ;;  %s891_s1 = inlined_call_operand.vmem [shape: f32[2,128], index: 1, kind: input, shape index: {}]   ;;  %s892_s2 = inlined_call_operand.vmem [shape: f32[1,128], index: 2, kind: input, shape index: {}]   ;;  %s893_s3 = inlined_call_operand.vmem [shape: f32[1,128], index: 3, kind: input, shape index: {}]   ;;  %s894_s4 = inlined_call_operand.vmem [shape: f32[128,128], index: 4, kind: input, shape index: {}]   ;;  %s895_s5 = inlined_call_operand.vmem [shape: f32[1,128], index: 5, kind: input, shape index: {}]   ;;  %s896_s6 = inlined_call_operand.hbm [shape: f32[2,1,128], index: 6, kind: output, shape index: {}]  }
   0x1   :  { %13 = vsyncpa [#allocation3 + $0x1], 0  ;;  %s730_s21 = smov 0   ;;  %s732_s22 = smov 0  }
   0x2   :  { %s734_s23 = smov 0   ;;  %s736_s24 = smov 0  }
   0x3 LB: > { %s751_s25 = sadd.s32 4294967295, %s688_s24   ;;  %s495_s26 = sadd.s32 4294967294, %s688_s24   ;;  %s688_s24 = sphi %s736_s24, %s902_s24   ;;  %s684_s23 = sphi %s734_s23, %s901_s23   ;;  %s680_s22 = sphi %s732_s22, %s900_s22   ;;  %s676_s21 = sphi %s730_s21, %s899_s21  }
   0x4   : > { %s755_s27 = sadd.s32 1, %s688_s24   ;;  %s157_s28 = sadd.s32 1, %s684_s23 }
   0x5   : > { %s154_s29 = ssub.s32 %s688_s24, %s755_s27  ;;  %p167_p0 = scmp.ne.s32.totalorder %s684_s23, %s680_s22 }
   0x6   : > { %p155_p1 = scmp.eq.s32.totalorder %s154_s29, 0  ;;  %p168_p2 = scmp.eq.s32.totalorder %s751_s25, 1 }
   0x7   : > { %p173_p3 = scmp.ne.s32.totalorder %s680_s22, %s676_s21  ;;  %p174_p4 = scmp.eq.s32.totalorder %s495_s26, 1 }
   0x8   : > { %s766_s30 = scalar_select %p155_p1, %s684_s23, %s157_s28  }
   0x9   : > { %p768_p5 = por %p168_p2, %p167_p0  ;;  %p772_p6 = por %p174_p4, %p173_p3 }
   0xa   : > { %p498_p7 = scmp.ge.s32.totalorder %s688_s24, 1  ;;  %p215_p8 = scmp.lt.s32.totalorder %s688_s24, 3 }
   0xc   : > { %p216_p9 = pnand %p498_p7, %p215_p8 }
   0xd   : > { %v339_v0 = vld [vmem:[%s894_s4] sm:$0xff] (!%p216_p9)  ;;  %v340_v1 = vld [vmem:[%s894_s4 + $0x8] sm:$0xff] (!%p216_p9)  ;;  %v341_v2 = vld [vmem:[%s894_s4 + $0x10] sm:$0xff] (!%p216_p9)  ;;  %v690_v3 = vmov (!%p216_p9), 0.0|0.0   ;;  %vm691_vm0 = vmmov (!%p216_p9), 0   ;;  %v692_v6 = vmov (!%p216_p9), 0.0   ;;  %v264_v28 = vlaneseq (!%p216_p9) }
   0xe   : > { %219 = sbr.rel (%p216_p9) target bundleno = 313 (0x139), region = 44  ;;  %557 = vmatprep.subr.bf16.mxu0 (!%p216_p9), %v690_v3  ;;  %v558_v4 = vpack.c.bf16 (!%p216_p9), %v340_v1, %v339_v0  ;;  %v342_v5 = vld [vmem:[%s894_s4 + $0x18] sm:$0xff] (!%p216_p9)  ;;  %554 = vmatprep.mubr.msk.f32.mxu0 (!%p216_p9), %vm691_vm0, %v692_v6  ;;  %v343_v8 = vld [vmem:[%s894_s4 + $0x20] sm:$0xff] (!%p216_p9)  ;;  %v344_v9 = vld [vmem:[%s894_s4 + $0x28] sm:$0xff] (!%p216_p9)  ;;  %v693_v26 = vmov (!%p216_p9), 1966171168  }
   0xf   : > { %v561_v7 = vpack.c.bf16 (!%p216_p9), %v342_v5, %v341_v2  ;;  %v249_v10 = vld [vmem:[%s891_s1] sm:$0x3] (!%p216_p9)  ;;  %v564_v12 = vpack.c.bf16 (!%p216_p9), %v344_v9, %v343_v8  ;;  %v345_v13 = vld [vmem:[%s894_s4 + $0x30] sm:$0xff] (!%p216_p9)  ;;  %v346_v14 = vld [vmem:[%s894_s4 + $0x38] sm:$0xff] (!%p216_p9)  ;;  %v262_v27 = vunpack.c.l.s4 (!%p216_p9), %v693_v26  ;;  %v265_v33 = vshrl.u32 (!%p216_p9), %v264_v28, 7  ;;  %p244_p10 = scmp.lt.s32.totalorder (!%p216_p9), %s751_s25, 1 }
  0x10   : > { %559 = vmatpush3.bf16.msra.mxu0 (!%p216_p9), %v558_v4  ;;  %v250_v11 = vmul.f32 (!%p216_p9), 0.0078125, %v249_v10  ;;  %v567_v17 = vpack.c.bf16 (!%p216_p9), %v346_v14, %v345_v13  ;;  %v347_v18 = vld [vmem:[%s894_s4 + $0x40] sm:$0xff] (!%p216_p9)  ;;  %v348_v19 = vld [vmem:[%s894_s4 + $0x48] sm:$0xff] (!%p216_p9)  ;;  %v349_v23 = vld [vmem:[%s894_s4 + $0x50] sm:$0xff] (!%p216_p9)  ;;  %s242_s28 = sand.u32 (!%p216_p9), 1, %s680_s22   ;;  %s501_s10 = sshll.u32 (!%p216_p9), %s751_s25, 4 }
  0x11   : > { %560 = vmatprep.subr.bf16.mxu0 (!%p216_p9), %v690_v3  ;;  %v570_v22 = vpack.c.bf16 (!%p216_p9), %v348_v19, %v347_v18  ;;  %v350_v24 = vld [vmem:[%s894_s4 + $0x58] sm:$0xff] (!%p216_p9)  ;;  %v351_v30 = vld [vmem:[%s894_s4 + $0x60] sm:$0xff] (!%p216_p9)  ;;  %v352_v31 = vld [vmem:[%s894_s4 + $0x68] sm:$0xff] (!%p216_p9)  ;;  %v263_v32 = vunpack.c.0.s8 (!%p216_p9), %v262_v27  ;;  %v292_v44 = vsub.s32 (!%p216_p9), 0, %v265_v33  ;;  %s243_s11 = scalar_lea.vmem (!%p216_p9), [#allocation2], %s242_s28  ;;  %s848_s15 = scalar_lea.hbm (!%p216_p9), %s896_s6, %s501_s10 }
  0x12   : > { %v251_v15 = vmul.f32 (!%p216_p9), %v250_v11, %v250_v11  ;;  %v573_v29 = vpack.c.bf16 (!%p216_p9), %v350_v24, %v349_v23  ;;  %v576_v34 = vpack.c.bf16 (!%p216_p9), %v352_v31, %v351_v30  ;;  %v353_v35 = vld [vmem:[%s894_s4 + $0x70] sm:$0xff] (!%p216_p9)  ;;  %v354_v36 = vld [vmem:[%s894_s4 + $0x78] sm:$0xff] (!%p216_p9)  ;;  %v257_v42 = vld [vmem:[%s892_s2] sm:$0x1] (!%p216_p9)  ;;  %s440_s12 = sshll.u32 (!%p216_p9), %s243_s11, 4  ;;  %s428_s16 = scalar_lea.sflag (!%p216_p9), [#allocation3], %s242_s28  ;;  %s850_s12 = int_to_ptr.vmem [resolvable:$true] %s440_s12 }
  0x13   : > { %v266_v37 = vsub.s32 (!%p216_p9), %v263_v32, %v265_v33  ;;  %v579_v38 = vpack.c.bf16 (!%p216_p9), %v354_v36, %v353_v35  ;;  %v278_v46 = vld [vmem:[%s893_s3] sm:$0x1] (!%p216_p9)  ;;  %s626_s17 = scalar_lea.vmem (!%p216_p9), %s850_s12, 16 }
  0x14   : > { %562 = vmatpush3.bf16.msra.mxu0 (!%p216_p9), %v561_v7  ;;  %v253_v16 = vrot.slane (!%p216_p9), %v251_v15, 7  ;;  %v355_v33 = vld [vmem:[%s895_s5] sm:$0x1] (!%p216_p9)  ;;  %p627_p11 = scmp.ne.s32.totalorder (!%p216_p9), %s850_s12, %s626_s17 }
  0x15   : > { %563 = vmatprep.subr.bf16.mxu0 %v690_v3  ;;  %s245_s13 = scalar_select %p244_p10, %s751_s25, 1 }
  0x16   : > { %v255_v20 = vsub.f32 %v250_v11, %v253_v16  ;;  %p628_p12 = pnand %p627_p11, %p768_p5  ;;  %s694_s25 = smov [#allocation2]  }
  0x17   : > { %s504_s14 = sshll.u32 %s245_s13, 6  ;;  %s630_s18 = sshll.u32 %s694_s25, 4  ;;  %s631_s18 = int_to_ptr.vmem [resolvable:$false] %s630_s18 }
  0x18   : > { %565 = vmatpush3.bf16.msra.mxu0 %v564_v12  ;;  %v256_v21 = vmax.f32 %v255_v20, 0.0  ;;  %s248_s19 = scalar_lea.vmem %s890_s0, %s504_s14  ;;  %p629_p13 = pneg %p628_p12 }
  0x19   : > { %566 = vmatprep.subr.bf16.mxu0 %v690_v3  ;;  %v281_v47 = vld [vmem:[%s248_s19] sm:$0xff]  ;;  %v282_v48 = vld [vmem:[%s248_s19 + $0x8] sm:$0xff]  ;;  %v283_v49 = vld [vmem:[%s248_s19 + $0x10] sm:$0xff]  ;;  %p633_p0 = scmp.lt.s32.totalorder %s850_s12, %s631_s18 }
  0x1a   : > { %v258_v25 = vadd.f32 1e-05, %v256_v21  ;;  %v284_v51 = vld [vmem:[%s248_s19 + $0x18] sm:$0xff]  ;;  %v285_v53 = vld [vmem:[%s248_s19 + $0x20] sm:$0xff]  ;;  %v286_v55 = vld [vmem:[%s248_s19 + $0x28] sm:$0xff] }
  0x1b   : > { %v287_v60 = vld [vmem:[%s248_s19 + $0x30] sm:$0xff]  ;;  %v288_v4 = vld [vmem:[%s248_s19 + $0x38] sm:$0xff]  ;;  %s632_s19 = scalar_lea.vmem %s631_s18, 32 }
  0x1c   : > { %568 = vmatpush3.bf16.msra.mxu0 %v567_v17  ;;  %624 = vrsqrt.f32 %v258_v25  ;;  %p634_p1 = scmp.lt.s32.totalorder %s632_s19, %s626_s17 }
  0x1d   : > { %569 = vmatprep.subr.bf16.mxu0 %v690_v3 }
  0x1e   : > { %p635_p2 = por %p634_p1, %p633_p0 }
  0x20   : > { %571 = vmatpush3.bf16.msra.mxu0 %v570_v22  ;;  %p636_p3 = pnand %p635_p2, %p629_p13 }
  0x21   : > { %572 = vmatprep.subr.bf16.mxu0 %v690_v3 }
  0x24   : > { %574 = vmatpush3.bf16.msra.mxu0 %v573_v29 }
  0x25   : > { %575 = vmatprep.subr.bf16.mxu0 %v690_v3 }
  0x26   : > { %v625_v39 = vpop.eup %624 }
  0x27   : > { %v267_v40 = vrot.slane %v625_v39, %v266_v37 }
  0x28   : > { %577 = vmatpush3.bf16.msra.mxu0 %v576_v34 }
  0x29   : > { %578 = vmatprep.subr.bf16.mxu0 %v690_v3  ;;  %v268_v41 = vcombine.high %v267_v40, %v267_v40 }
  0x2b   : > { %v275_v43 = vrot.slane %v268_v41, %v266_v37 }
  0x2c   : > { %580 = vmatpush3.bf16.msra.mxu0 %v579_v38 }
  0x2d   : > { %v277_v45 = vmul.f32 %v275_v43, %v257_v42 }
  0x2f   : > { %v279_v50 = vmul.f32 %v277_v45, %v250_v11  ;;  %v293_v52 = vrot.slane %v277_v45, %v292_v44 }
  0x31   : > { %v280_v54 = vsub.f32 %v278_v46, %v279_v50  ;;  %v295_v56 = vmul.f32 %v293_v52, %v281_v47  ;;  %v296_v57 = vmul.f32 %v293_v52, %v282_v48  ;;  %v297_v58 = vmul.f32 %v293_v52, %v283_v49 }
  0x32   : > { %v298_v59 = vmul.f32 %v293_v52, %v284_v51  ;;  %v299_v61 = vmul.f32 %v293_v52, %v285_v53  ;;  %v300_v63 = vmul.f32 %v293_v52, %v286_v55  ;;  %v301_v5 = vmul.f32 %v293_v52, %v287_v60 }
  0x33   : > { %v307_v62 = vrot.slane %v280_v54, %v292_v44  ;;  %v302_v10 = vmul.f32 %v293_v52, %v288_v4 }
  0x35   : > { %v309_v0 = vadd.f32 %v307_v62, %v295_v56  ;;  %v310_v1 = vadd.f32 %v307_v62, %v296_v57  ;;  %v311_v2 = vadd.f32 %v307_v62, %v297_v58  ;;  %v312_v3 = vadd.f32 %v307_v62, %v298_v59 }
  0x36   : > { %v313_v6 = vadd.f32 %v307_v62, %v299_v61  ;;  %v314_v11 = vadd.f32 %v307_v62, %v300_v63  ;;  %v315_v14 = vadd.f32 %v307_v62, %v301_v5  ;;  %v316_v17 = vadd.f32 %v307_v62, %v302_v10 }
  0x37   : > { %v317_v7 = vmax.f32 %v309_v0, 0.0  ;;  %v318_v8 = vmax.f32 %v310_v1, 0.0  ;;  %v319_v9 = vmax.f32 %v311_v2, 0.0  ;;  %v320_v12 = vmax.f32 %v312_v3, 0.0 }
  0x38   : > { %v321_v15 = vmax.f32 %v313_v6, 0.0  ;;  %v322_v18 = vmax.f32 %v314_v11, 0.0  ;;  %v323_v20 = vmax.f32 %v315_v14, 0.0  ;;  %v324_v22 = vmax.f32 %v316_v17, 0.0 }
  0x39   : > { %v325_v13 = vadd.f32 %v318_v8, %v317_v7 }
  0x3b   : > { %v326_v16 = vadd.f32 %v325_v13, %v319_v9 }
  0x3d   : > { %v327_v19 = vadd.f32 %v326_v16, %v320_v12 }
  0x3f   : > { %v328_v21 = vadd.f32 %v327_v19, %v321_v15 }
  0x41   : > { %v329_v23 = vadd.f32 %v328_v21, %v322_v18 }
  0x43   : > { %v330_v24 = vadd.f32 %v329_v23, %v323_v20 }
  0x45   : > { %v331_v25 = vadd.f32 %v330_v24, %v324_v22 }
  0x47   : > { %v332_v26 = vrot.slane %v331_v25, 4 }
  0x49   : > { %v333_v27 = vadd.f32 %v332_v26, %v331_v25 }
  0x4b   : > { %v334_v28 = vrot.slane %v333_v27, 2 }
  0x4d   : > { %v335_v29 = vadd.f32 %v334_v28, %v333_v27 }
  0x4f   : > { %v336_v30 = vrot.slane %v335_v29, 1 }
  0x51   : > { %v337_v31 = vadd.f32 %v336_v30, %v335_v29 }
  0x53   : > { %v338_v32 = vmul.f32 0.015625, %v337_v31 }
  0x55   : > { %555 = vmatmul.mubr.f32.vlgmr.msra.gmra.mrb[0].mxu0 %v338_v32 }
 0x128   : > { %v422_v34 = vpop.f32.mrb[0].mxu0 }
 0x129   : > { %v423_v35 = vadd.f32 %v422_v34, %v355_v33  ;;  %v556_v36 = vpop.f32.mrb[1].mxu0 }
 0x12b   : > { %426 = vst [vmem:[%s243_s11] sm:$0x1] %v423_v35 }
 0x12c   : > { %639 = shalt.err (!%p636_p3)
}
 0x12d   : > { %s640_s20 = scalar_lea.hbm %s848_s15, 16  ;;  %s644_s29 = scalar_lea.hbm %s896_s6, 32 }
 0x12e   : > { %p641_p4 = scmp.ne.s32.totalorder %s848_s15, %s640_s20  ;;  %p645_p9 = scmp.lt.u32.totalorder %s848_s15, %s896_s6 }
 0x12f   : > { %p646_p10 = scmp.lt.u32.totalorder %s644_s29, %s640_s20  ;;  %p648_p12 = scmp.lt.u32.totalorder %s640_s20, %s848_s15 }
 0x130   : > { %p642_p7 = pnand %p641_p4, %p768_p5 }
 0x131   : > { %p647_p11 = por %p646_p10, %p645_p9 }
 0x132   : > { %p643_p8 = pneg %p642_p7 }
 0x133   : > { %p649_p13 = por %p648_p12, %p647_p11 }
 0x135   : > { %p650_p0 = pnand %p649_p13, %p643_p8 }
 0x137   : > { %653 = shalt.err (!%p650_p0)
}
 0x138   : > { %581 = dma.vmem_to_hbm [thread:$0]  (%p768_p5), %s850_s12, 16, %s848_s15, %s428_s16  }
 0x139 PF: > { %p587_p1 = scmp.ge.s32.totalorder %s688_s24, 2  ;;  %s452_s11 = sand.u32 1, %s676_s21  }
 0x13a   : > { %s453_s13 = scalar_lea.sflag [#allocation3], %s452_s11 }
 0x13b   : > { %p584_p2 = pnand %p587_p1, %p772_p6 }
 0x13d   : > { %671 = dma.done.wait (!%p584_p2), %s453_s13, 16  }
 0x13e   : > { %673 = vsyncadd (!%p584_p2), %s453_s13, 4294967280  ;;  %p16_p3 = scmp.ge.s32.totalorder %s755_s27, 4   ;;  %s899_s21 = smov %s680_s22 }
 0x13f   : > { %s900_s22 = smov %s684_s23  ;;  %s901_s23 = smov %s766_s30 }
 0x140   : > { %s902_s24 = smov %s755_s27  ;;  %18 = sbr.rel (!%p16_p3) target bundleno = 3 (0x3), region = 79 }
 0x147   :  { %457 = vsyncpa [#allocation3], 1 }
 0x148   :  { %459 = vsyncpa [#allocation3 + $0x1], 1 }

// kernel: simplenet_forward.8
= control target key start
LH: loop header
LB: loop body
LE: loop exit
PB: predicated region body
PF: predicated region fallthrough
CT: control target
= control target key end

     0   :  { %s2422_s12 = smov 0   ;;  %s2955_s0 = inlined_call_operand.vmem [shape: bf16[2,10,10,128], index: 0, kind: input, shape index: {}]   ;;  %s2956_s1 = inlined_call_operand.vmem [shape: bf16[9,128,128], index: 1, kind: input, shape index: {}]   ;;  %s2957_s2 = inlined_call_operand.vmem [shape: f32[2,64,128], index: 2, kind: output, shape index: {0}]   ;;  %s2958_s3 = inlined_call_operand.vmem [shape: f32[2,128], index: 3, kind: output, shape index: {1}]  }
   0x1 LB: > { %s1677_s13 = sadd.s32 4294967295, %s2399_s12   ;;  %p1681_p0 = scmp.ge.s32.totalorder %s2399_s12, 1  ;;  %s2399_s12 = sphi %s2422_s12, %s14_s12  }
   0x2   : > { %p135_p1 = scmp.lt.s32.totalorder %s2399_s12, 3 }
   0x4   : > { %p136_p2 = pnand %p1681_p0, %p135_p1 }
   0x5   : > { %p159_p3 = scmp.lt.s32.totalorder (!%p136_p2), %s1677_s13, 1  ;;  %p1685_p4 = scmp.ne.s32.totalorder (!%p136_p2), %s1677_s13, 0 }
   0x6   : > { %139 = sbr.rel (%p136_p2) target bundleno = 432 (0x1b0), region = 28 }
   0xd   : > { %s160_s14 = scalar_select %p159_p3, %s1677_s13, 1 }
   0xe   : > { %173 = sbr.rel (%p1685_p4) target bundleno = 21 (0x15), region = 32  ;;  %v2401_v0 = vmov (!%p1685_p4), 0.0  }
   0xf   : > { %s2302_s15 = smul.u32 80, %s160_s14  ;;  %s1897_s16 = sshll.u32 %s160_s14, 6  ;;  %174 = vst [vmem:[%s2958_s3] sm:$0x3] (!%p1685_p4), %v2401_v0 }
  0x10   : > { %s2433_s19 = scalar_lea.vmem %s2957_s2, %s1897_s16 }
  0x11   : > { %s2438_s22 = scalar_lea.vmem %s2955_s0, %s2302_s15 }
  0x15 PF: > { %v2312_v1 = vld [vmem:[%s2956_s1 + $0x40] sm:$0xff]   ;;  %v2314_v3 = vld [vmem:[%s2956_s1 + $0x48] sm:$0xff]   ;;  %v2316_v5 = vld [vmem:[%s2956_s1 + $0x50] sm:$0xff]   ;;  %vm251_vm0 = vcmask 1046528   ;;  %vm531_vm1 = vcmask 1045504   ;;  %vm1612_vm2 = vcmask 1040384  }
  0x16   : > { %v2313_v2 = vld [vmem:[%s2956_s1 + $0x100] sm:$0xff]   ;;  %2006 = vmatprep.subr.bf16.mxu1 %v2312_v1  ;;  %v2315_v4 = vld [vmem:[%s2956_s1 + $0x108] sm:$0xff]   ;;  %v2317_v6 = vld [vmem:[%s2956_s1 + $0x110] sm:$0xff]  }
  0x17   : > { %2102 = vmatprep.subr.bf16.mxu0 %v2313_v2  ;;  %2007 = vmatpush3.bf16.msra.mxu1 %v2312_v1  ;;  %v2318_v7 = vld [vmem:[%s2956_s1 + $0x58] sm:$0xff]   ;;  %v2320_v9 = vld [vmem:[%s2956_s1 + $0x60] sm:$0xff]   ;;  %v2322_v11 = vld [vmem:[%s2956_s1 + $0x68] sm:$0xff]  }
  0x18   : > { %2103 = vmatpush3.bf16.msra.mxu0 %v2313_v2  ;;  %2008 = vmatprep.subr.bf16.mxu1 %v2314_v3  ;;  %v2319_v8 = vld [vmem:[%s2956_s1 + $0x118] sm:$0xff]   ;;  %v2321_v10 = vld [vmem:[%s2956_s1 + $0x120] sm:$0xff]   ;;  %v2323_v12 = vld [vmem:[%s2956_s1 + $0x128] sm:$0xff]  }
  0x19   : > { %2104 = vmatprep.subr.bf16.mxu0 %v2315_v4  ;;  %v2480_v13 = vld [vmem:[%s2438_s22] sm:$0xf]  ;;  %v2483_v14 = vld [vmem:[%s2438_s22 + $0x4] sm:$0x1]  ;;  %v2486_v15 = vld [vmem:[%s2438_s22 + $0x8] sm:$0xf] }
  0x1a   : > { %v2489_v16 = vld [vmem:[%s2438_s22 + $0xc] sm:$0x1]  ;;  %v195_v17 = vunpack.c.l.bf16 %v2480_v13  ;;  %v196_v18 = vunpack.c.l.bf16 %v2483_v14  ;;  %v197_v19 = vunpack.c.l.bf16 %v2486_v15  ;;  %v2496_v21 = vld [vmem:[%s2438_s22 + $0x10] sm:$0xf]  ;;  %v2499_v22 = vld [vmem:[%s2438_s22 + $0x14] sm:$0x1] }
  0x1b   : > { %2009 = vmatpush3.bf16.msra.mxu1 %v2314_v3  ;;  %v198_v20 = vunpack.c.l.bf16 %v2489_v16  ;;  %v2508_v26 = vld [vmem:[%s2438_s22 + $0x18] sm:$0xf]  ;;  %v199_v27 = vunpack.c.l.bf16 %v2496_v21  ;;  %v2324_v28 = vld [vmem:[%s2956_s1 + $0x70] sm:$0xff]   ;;  %v2517_v30 = vld [vmem:[%s2438_s22 + $0x1c] sm:$0x1]  ;;  %v200_v31 = vunpack.c.l.bf16 %v2499_v22  ;;  %v1746_v38 = vcombine.low %v2486_v15, %v2496_v21 }
  0x1c   : > { %2105 = vmatpush3.bf16.msra.mxu0 %v2315_v4  ;;  %2010 = vmatprep.subr.bf16.mxu1 %v2316_v5  ;;  %v252_v23 = vrot.slane %v195_v17, 1  ;;  %v253_v24 = vrot.slane %v196_v18, 1  ;;  %v255_v25 = vrot.slane %v197_v19, 1  ;;  %v201_v32 = vunpack.c.l.bf16 %v2508_v26  ;;  %v2325_v33 = vld [vmem:[%s2956_s1 + $0x130] sm:$0xff]   ;;  %v2529_v37 = vld [vmem:[%s2438_s22 + $0x20] sm:$0xf] }
  0x1d   : > { %2106 = vmatprep.subr.bf16.mxu0 %v2317_v6  ;;  %v256_v29 = vrot.slane %v198_v20, 1  ;;  %v202_v35 = vunpack.c.l.bf16 %v2517_v30  ;;  %v258_v36 = vrot.slane %v199_v27, 1  ;;  %v259_v40 = vrot.slane %v200_v31, 1  ;;  %v2539_v42 = vld [vmem:[%s2438_s22 + $0x24] sm:$0x1]  ;;  %v2326_v48 = vld [vmem:[%s2956_s1 + $0x78] sm:$0xff]  }
  0x1e   : > { %v254_v34 = vsel %vm251_vm0, %v252_v23, %v253_v24  ;;  %v261_v41 = vrot.slane %v201_v32, 1  ;;  %v203_v43 = vunpack.c.l.bf16 %v2529_v37  ;;  %v204_v46 = vunpack.c.l.bf16 %v2539_v42  ;;  %v2327_v51 = vld [vmem:[%s2956_s1 + $0x138] sm:$0xff]   ;;  %v2328_v55 = vld [vmem:[%s2956_s1] sm:$0xff]   ;;  %v2330_v59 = vld [vmem:[%s2956_s1 + $0x8] sm:$0xff]  }
  0x1f   : > { %2011 = vmatpush3.bf16.msra.mxu1 %v2316_v5  ;;  %v257_v39 = vsel %vm251_vm0, %v255_v25, %v256_v29  ;;  %v262_v45 = vrot.slane %v202_v35, 1  ;;  %v1747_v47 = vcombine.low %v2508_v26, %v2529_v37  ;;  %v260_v49 = vsel %vm251_vm0, %v258_v36, %v259_v40  ;;  %v2329_v57 = vld [vmem:[%s2956_s1 + $0x140] sm:$0xff]   ;;  %v2331_v61 = vld [vmem:[%s2956_s1 + $0x148] sm:$0xff]   ;;  %v2583_v2 = vld [vmem:[%s2438_s22 + $0x30] sm:$0xf] }
  0x20   : > { %2107 = vmatpush3.bf16.msra.mxu0 %v2317_v6  ;;  %2012 = vmatprep.subr.bf16.mxu1 %v2318_v7  ;;  %v284_v44 = vpack.c.bf16 %v257_v39, %v254_v34  ;;  %v264_v50 = vrot.slane %v203_v43, 1  ;;  %v854_v52 = vpack.c.bf16 %v260_v49, %v257_v39  ;;  %v265_v53 = vrot.slane %v204_v46, 1  ;;  %v2575_v62 = vld [vmem:[%s2438_s22 + $0x28] sm:$0xf]  ;;  %v2578_v63 = vld [vmem:[%s2438_s22 + $0x2c] sm:$0x1] }
  0x21   : > { %2108 = vmatprep.subr.bf16.mxu0 %v2319_v8  ;;  %v263_v54 = vsel %vm251_vm0, %v261_v41, %v262_v45  ;;  %v205_v0 = vunpack.c.l.bf16 %v2575_v62  ;;  %v206_v1 = vunpack.c.l.bf16 %v2578_v63  ;;  %v535_v3 = vrot.slane %v197_v19, 2  ;;  %v2591_v5 = vld [vmem:[%s2438_s22 + $0x34] sm:$0x1]  ;;  %v2616_v24 = vld [vmem:[%s2438_s22 + $0x40] sm:$0xf] }
  0x22   : > { %2022 = vmatprep.mubr.bf16.mxu1 %v284_v44  ;;  %2118 = vmatprep.mubr.bf16.mxu0 %v854_v52  ;;  %v266_v56 = vsel %vm251_vm0, %v264_v50, %v265_v53  ;;  %v2566_v58 = vpack.c.bf16 %v263_v54, %v260_v49  ;;  %v536_v4 = vrot.slane %v198_v20, 2  ;;  %v207_v6 = vunpack.c.l.bf16 %v2583_v2  ;;  %v2612_v20 = vld [vmem:[%s2438_s22 + $0x3c] sm:$0x1]  ;;  %v2628_v34 = vld [vmem:[%s2438_s22 + $0x44] sm:$0x1] }
  0x23   : > { %2013 = vmatpush3.bf16.msra.mxu1 %v2318_v7  ;;  %v855_v60 = vpack.c.bf16 %v266_v56, %v263_v54  ;;  %v1748_v7 = vcombine.low %v2575_v62, %v2583_v2  ;;  %v538_v16 = vrot.slane %v199_v27, 2  ;;  %v539_v25 = vrot.slane %v200_v31, 2  ;;  %v2335_v53 = vld [vmem:[%s2956_s1 + $0x158] sm:$0xff]   ;;  %v2345_v63 = vld [vmem:[%s2956_s1 + $0x80] sm:$0xff]  }
  0x24   : > { %2109 = vmatpush3.bf16.msra.mxu0 %v2319_v8  ;;  %2014 = vmatprep.subr.bf16.mxu1 %v2320_v9  ;;  %v2332_v8 = vld [vmem:[%s2956_s1 + $0x10] sm:$0xff]   ;;  %v270_v19 = vrot.slane %v207_v6, 1  ;;  %v211_v36 = vunpack.c.l.bf16 %v2616_v24  ;;  %v212_v31 = vunpack.c.l.bf16 %v2628_v34  ;;  %v547_v30 = vrot.slane %v205_v0, 2 }
  0x25   : > { %2110 = vmatprep.subr.bf16.mxu0 %v2321_v10  ;;  %v2652_v52 = vsel %vm531_vm1, %v538_v16, %v539_v25  ;;  %v541_v16 = vrot.slane %v201_v32, 2  ;;  %v544_v25 = vrot.slane %v203_v43, 2  ;;  %v2343_v32 = vld [vmem:[%s2956_s1 + $0x178] sm:$0xff]   ;;  %v2350_v34 = vld [vmem:[%s2956_s1 + $0x90] sm:$0xff]  }
  0x26   : > { %v850_v44 = vrot.slane %v211_v36, 1  ;;  %v851_v50 = vrot.slane %v212_v31, 1 }
  0x27   : > { %2015 = vmatpush3.bf16.msra.mxu1 %v2320_v9  ;;  %v267_v9 = vrot.slane %v205_v0, 1  ;;  %v2346_v0 = vld [vmem:[%s2956_s1 + $0x180] sm:$0xff]  }
  0x28   : > { %2111 = vmatpush3.bf16.msra.mxu0 %v2321_v10  ;;  %2016 = vmatprep.subr.bf16.mxu1 %v2322_v11  ;;  %v268_v10 = vrot.slane %v206_v1, 1 }
  0x29   : > { %2112 = vmatprep.subr.bf16.mxu0 %v2323_v12 }
  0x2a   : > { %v269_v27 = vsel %vm251_vm0, %v267_v9, %v268_v10  ;;  %v2340_v9 = vld [vmem:[%s2956_s1 + $0x30] sm:$0xff]  }
  0x2b   : > { %2017 = vmatpush3.bf16.msra.mxu1 %v2322_v11  ;;  %v208_v11 = vunpack.c.l.bf16 %v2591_v5  ;;  %v2631_v39 = vpack.c.bf16 %v269_v27, %v266_v56  ;;  %v2662_v56 = vsel %vm251_vm0, %v850_v44, %v851_v50  ;;  %v2341_v10 = vld [vmem:[%s2956_s1 + $0x170] sm:$0xff]   ;;  %v2348_v5 = vld [vmem:[%s2956_s1 + $0x88] sm:$0xff]   ;;  %v996_v44 = vrot.slane %v211_v36, 2 }
  0x2c   : > { %2113 = vmatpush3.bf16.msra.mxu0 %v2323_v12  ;;  %2018 = vmatprep.subr.bf16.mxu1 %v2324_v28  ;;  %v2605_v12 = vld [vmem:[%s2438_s22 + $0x38] sm:$0xf]  ;;  %v2748_v50 = vcombine.low %v2529_v37, %v2575_v62  ;;  %v2389_v37 = vld [vmem:[%s2956_s1 + $0x220] sm:$0xff]   ;;  %v2391_v62 = vld [vmem:[%s2956_s1 + $0x230] sm:$0xff]  }
  0x2d   : > { %2114 = vmatprep.subr.bf16.mxu0 %v2325_v33  ;;  %v209_v23 = vunpack.c.l.bf16 %v2605_v12  ;;  %v271_v29 = vrot.slane %v208_v11, 1  ;;  %v1749_v45 = vcombine.low %v2605_v12, %v2616_v24  ;;  %v2771_v14 = vcombine.low %v2583_v2, %v2605_v12  ;;  %v2392_v2 = vld [vmem:[%s2956_s1 + $0x238] sm:$0xff]  }
  0x2f   : > { %2019 = vmatpush3.bf16.msra.mxu1 %v2324_v28  ;;  %v2333_v28 = vld [vmem:[%s2956_s1 + $0x150] sm:$0xff]   ;;  %v273_v22 = vrot.slane %v209_v23, 1  ;;  %v272_v40 = vsel %vm251_vm0, %v270_v19, %v271_v29  ;;  %v542_v19 = vrot.slane %v202_v35, 2  ;;  %v548_v35 = vrot.slane %v206_v1, 2 }
  0x30   : > { %2115 = vmatpush3.bf16.msra.mxu0 %v2325_v33  ;;  %2020 = vmatprep.subr.bf16.mxu1 %v2326_v48  ;;  %v210_v33 = vunpack.c.l.bf16 %v2612_v20  ;;  %v856_v49 = vpack.c.bf16 %v272_v40, %v269_v27  ;;  %v2342_v27 = vld [vmem:[%s2956_s1 + $0x38] sm:$0xff]   ;;  %v551_v29 = vrot.slane %v208_v11, 2 }
  0x31   : > { %2116 = vmatprep.subr.bf16.mxu0 %v2327_v51  ;;  %v2707_v42 = vsel %vm531_vm1, %v541_v16, %v542_v19  ;;  %v2730_v11 = vsel %vm531_vm1, %v547_v30, %v548_v35  ;;  %v2357_v30 = vld [vmem:[%s2956_s1 + $0x1a8] sm:$0xff]   ;;  %v2359_v35 = vld [vmem:[%s2956_s1 + $0xb0] sm:$0xff]  }
  0x32   : > { %v274_v41 = vrot.slane %v210_v33, 1 }
  0x33   : > { %2021 = vmatpush3.bf16.msra.mxu1 %v2326_v48  ;;  %v2334_v48 = vld [vmem:[%s2956_s1 + $0x18] sm:$0xff]  }
  0x34   : > { %2117 = vmatpush3.bf16.msra.mxu0 %v2327_v51  ;;  %2030 = vmatprep.subr.bf16.mxu1 %v2328_v55  ;;  %v2649_v51 = vsel %vm531_vm1, %v535_v3, %v536_v4  ;;  %v275_v54 = vsel %vm251_vm0, %v273_v22, %v274_v41  ;;  %v2337_v3 = vld [vmem:[%s2956_s1 + $0x160] sm:$0xff]   ;;  %v2338_v4 = vld [vmem:[%s2956_s1 + $0x28] sm:$0xff]   ;;  %v554_v41 = vrot.slane %v210_v33, 2  ;;  %v533_v33 = vrot.slane %v196_v18, 2 }
  0x35   : > { %2126 = vmatprep.subr.bf16.mxu0 %v2329_v57  ;;  %v2775_v18 = vld [vmem:[%s2438_s22 + $0x48] sm:$0xf] }
  0x36   : > { %2023 = vmatmul.mubr.bf16.vlgmr.msra.gmra.mrb[0].mxu1 %v2566_v58 }
  0x37   : > { %2031 = vmatpush3.bf16.msra.mxu1 %v2328_v55  ;;  %2119 = vmatmul.mubr.bf16.vlgmr.msra.gmra.mrb[0].mxu0 %v855_v60  ;;  %v2659_v55 = vpack.c.bf16 %v275_v54, %v272_v40  ;;  %v1000_v60 = vpack.c.bf16 %v2652_v52, %v2649_v51  ;;  %v553_v40 = vrot.slane %v209_v23, 2  ;;  %v532_v23 = vrot.slane %v195_v17, 2 }
  0x38   : > { %2127 = vmatpush3.bf16.msra.mxu0 %v2329_v57  ;;  %2032 = vmatprep.subr.bf16.mxu1 %v2330_v59  ;;  %v1686_v57 = vcombine.low %v2480_v13, %v2486_v15  ;;  %v2351_v13 = vld [vmem:[%s2956_s1 + $0x190] sm:$0xff]  }
  0x39   : > { %2128 = vmatprep.subr.bf16.mxu0 %v2331_v61  ;;  %2026 = vmatprep.mubr.bf16.mxu1 %v2631_v39  ;;  %v2760_v36 = vsel %vm531_vm1, %v553_v40, %v554_v41  ;;  %v534_v17 = vsel %vm531_vm1, %v532_v23, %v533_v33  ;;  %v2367_v40 = vld [vmem:[%s2956_s1 + $0x1c8] sm:$0xff]   ;;  %v2376_v15 = vld [vmem:[%s2956_s1 + $0xf0] sm:$0xff]   ;;  %v2383_v23 = vld [vmem:[%s2956_s1 + $0x200] sm:$0xff]  }
  0x3a   : > { %2122 = vmatprep.mubr.bf16.mxu0 %v856_v49  ;;  %v2349_v49 = vld [vmem:[%s2956_s1 + $0x188] sm:$0xff]  }
  0x3b   : > { %2033 = vmatpush3.bf16.msra.mxu1 %v2330_v59  ;;  %v857_v59 = vpack.c.bf16 %v2662_v56, %v275_v54  ;;  %v213_v54 = vunpack.c.l.bf16 %v2775_v18  ;;  %v2384_v33 = vld [vmem:[%s2956_s1 + $0x208] sm:$0xff]  }
  0x3c   : > { %2129 = vmatpush3.bf16.msra.mxu0 %v2331_v61  ;;  %2034 = vmatprep.subr.bf16.mxu1 %v2332_v8  ;;  %v2336_v61 = vld [vmem:[%s2956_s1 + $0x20] sm:$0xff]  }
  0x3d   : > { %2130 = vmatprep.subr.bf16.mxu0 %v2333_v28 }
  0x3e   : > { %2027 = vmatmul.mubr.bf16.gmra.mrb[4].mxu1 %v2659_v55 }
  0x3f   : > { %2035 = vmatpush3.bf16.msra.mxu1 %v2332_v8  ;;  %2123 = vmatmul.mubr.bf16.gmra.mrb[4].mxu0 %v857_v59  ;;  %v2339_v8 = vld [vmem:[%s2956_s1 + $0x168] sm:$0xff]   ;;  %v2353_v59 = vld [vmem:[%s2956_s1 + $0x198] sm:$0xff]  }
  0x40   : > { %2131 = vmatpush3.bf16.msra.mxu0 %v2333_v28  ;;  %2036 = vmatprep.subr.bf16.mxu1 %v2334_v48  ;;  %v545_v28 = vrot.slane %v204_v46, 2  ;;  %v550_v46 = vrot.slane %v207_v6, 2  ;;  %v1687_v6 = vcombine.low %v2496_v21, %v2508_v26  ;;  %v2378_v21 = vld [vmem:[%s2956_s1 + $0x1f0] sm:$0xff]   ;;  %v2388_v26 = vld [vmem:[%s2956_s1 + $0x218] sm:$0xff]  }
  0x41   : > { %2132 = vmatprep.subr.bf16.mxu0 %v2335_v53  ;;  %2046 = vmatprep.mubr.bf16.mxu1 %v1686_v57  ;;  %v2352_v57 = vld [vmem:[%s2956_s1 + $0x98] sm:$0xff]  }
  0x42   : > { %2142 = vmatprep.mubr.bf16.mxu0 %v1000_v60  ;;  %v2710_v43 = vsel %vm531_vm1, %v544_v25, %v545_v28  ;;  %v2733_v22 = vsel %vm531_vm1, %v550_v46, %v551_v29  ;;  %v564_v60 = vpack.c.bf16 %v2649_v51, %v534_v17  ;;  %v2356_v28 = vld [vmem:[%s2956_s1 + $0xa8] sm:$0xff]   ;;  %v2360_v46 = vld [vmem:[%s2956_s1 + $0x1b0] sm:$0xff]   ;;  %v2362_v29 = vld [vmem:[%s2956_s1 + $0xb8] sm:$0xff]  }
  0x43   : > { %2037 = vmatpush3.bf16.msra.mxu1 %v2334_v48  ;;  %v1001_v1 = vpack.c.bf16 %v2710_v43, %v2707_v42  ;;  %v997_v48 = vrot.slane %v212_v31, 2  ;;  %v1002_v20 = vpack.c.bf16 %v2733_v22, %v2730_v11  ;;  %v2841_v41 = vpack.c.bf16 %v2730_v11, %v2710_v43 }
  0x44   : > { %2133 = vmatpush3.bf16.msra.mxu0 %v2335_v53  ;;  %2038 = vmatprep.subr.bf16.mxu1 %v2336_v61  ;;  %v2855_v43 = vpack.c.bf16 %v2760_v36, %v2733_v22  ;;  %v1822_v11 = vcombine.low %v2616_v24, %v2775_v18  ;;  %v2372_v22 = vld [vmem:[%s2956_s1 + $0xe0] sm:$0xff]  }
  0x45   : > { %2134 = vmatprep.subr.bf16.mxu0 %v2337_v3  ;;  %v2763_v31 = vsel %vm531_vm1, %v996_v44, %v997_v48  ;;  %v2370_v44 = vld [vmem:[%s2956_s1 + $0xd8] sm:$0xff]  }
  0x46   : > { %v1003_v53 = vpack.c.bf16 %v2763_v31, %v2760_v36  ;;  %v2371_v48 = vld [vmem:[%s2956_s1 + $0x1d8] sm:$0xff]  }
  0x47   : > { %2039 = vmatpush3.bf16.msra.mxu1 %v2336_v61  ;;  %v194_v61 = vld [vmem:[%s2438_s22 + $0x4c] sm:$0x1] }
  0x48   : > { %2135 = vmatpush3.bf16.msra.mxu0 %v2337_v3  ;;  %2040 = vmatprep.subr.bf16.mxu1 %v2338_v4  ;;  %v1283_v3 = vrot.slane %v213_v54, 1 }
  0x49   : > { %2136 = vmatprep.subr.bf16.mxu0 %v2339_v8 }
  0x4b   : > { %2041 = vmatpush3.bf16.msra.mxu1 %v2338_v4  ;;  %v1426_v4 = vrot.slane %v213_v54, 2 }
  0x4c   : > { %2137 = vmatpush3.bf16.msra.mxu0 %v2339_v8  ;;  %2042 = vmatprep.subr.bf16.mxu1 %v2340_v9  ;;  %v214_v8 = vunpack.c.l.bf16 %v194_v61 }
  0x4d   : > { %2138 = vmatprep.subr.bf16.mxu0 %v2341_v10 }
  0x4e   : > { %v1284_v51 = vrot.slane %v214_v8, 1  ;;  %v1427_v16 = vrot.slane %v214_v8, 2 }
  0x4f   : > { %2043 = vmatpush3.bf16.msra.mxu1 %v2340_v9  ;;  %v2354_v9 = vld [vmem:[%s2956_s1 + $0xa0] sm:$0xff]  }
  0x50   : > { %2139 = vmatpush3.bf16.msra.mxu0 %v2341_v10  ;;  %2044 = vmatprep.subr.bf16.mxu1 %v2342_v27  ;;  %v2355_v10 = vld [vmem:[%s2956_s1 + $0x1a0] sm:$0xff]   ;;  %v2796_v19 = vsel %vm251_vm0, %v1283_v3, %v1284_v51  ;;  %v2799_v25 = vsel %vm531_vm1, %v1426_v4, %v1427_v16 }
  0x51   : > { %2140 = vmatprep.subr.bf16.mxu0 %v2343_v32 }
  0x53   : > { %2045 = vmatpush3.bf16.msra.mxu1 %v2342_v27  ;;  %v1287_v27 = vpack.c.bf16 %v2796_v19, %v2662_v56 }
  0x54   : > { %2141 = vmatpush3.bf16.msra.mxu0 %v2343_v32  ;;  %2054 = vmatprep.subr.bf16.mxu1 %v2345_v63  ;;  %v1430_v32 = vpack.c.bf16 %v2799_v25, %v2763_v31 }
  0x55   : > { %2150 = vmatprep.subr.bf16.mxu0 %v2346_v0 }
  0x56   : > { %2047 = vmatmul.mubr.bf16.vlgmr.msra.gmra.mrb[0].mxu1 %v1687_v6 }
  0x57   : > { %2055 = vmatpush3.bf16.msra.mxu1 %v2345_v63  ;;  %2143 = vmatmul.mubr.bf16.vlgmr.msra.gmra.mrb[0].mxu0 %v1001_v1  ;;  %v2363_v63 = vld [vmem:[%s2956_s1 + $0x1b8] sm:$0xff]   ;;  %v2365_v1 = vld [vmem:[%s2956_s1 + $0x1c0] sm:$0xff]  }
  0x58   : > { %2151 = vmatpush3.bf16.msra.mxu0 %v2346_v0  ;;  %2056 = vmatprep.subr.bf16.mxu1 %v2348_v5  ;;  %v2364_v0 = vld [vmem:[%s2956_s1 + $0xc0] sm:$0xff]  }
  0x59   : > { %2152 = vmatprep.subr.bf16.mxu0 %v2349_v49  ;;  %2050 = vmatprep.mubr.bf16.mxu1 %v2748_v50 }
  0x5a   : > { %2146 = vmatprep.mubr.bf16.mxu0 %v1002_v20  ;;  %v2375_v20 = vld [vmem:[%s2956_s1 + $0x1e8] sm:$0xff]  }
  0x5b   : > { %2057 = vmatpush3.bf16.msra.mxu1 %v2348_v5  ;;  %v2366_v5 = vld [vmem:[%s2956_s1 + $0xc8] sm:$0xff]  }
  0x5c   : > { %2153 = vmatpush3.bf16.msra.mxu0 %v2349_v49  ;;  %2058 = vmatprep.subr.bf16.mxu1 %v2350_v34  ;;  %v2373_v49 = vld [vmem:[%s2956_s1 + $0x1e0] sm:$0xff]  }
  0x5d   : > { %2154 = vmatprep.subr.bf16.mxu0 %v2351_v13 }
  0x5e   : > { %2051 = vmatmul.mubr.bf16.gmra.mrb[4].mxu1 %v2771_v14 }
  0x5f   : > { %2059 = vmatpush3.bf16.msra.mxu1 %v2350_v34  ;;  %2147 = vmatmul.mubr.bf16.gmra.mrb[4].mxu0 %v1003_v53  ;;  %v2387_v34 = vld [vmem:[%s2956_s1 + $0x210] sm:$0xff]  }
  0x60   : > { %2155 = vmatpush3.bf16.msra.mxu0 %v2351_v13  ;;  %2060 = vmatprep.subr.bf16.mxu1 %v2352_v57 }
  0x61   : > { %2156 = vmatprep.subr.bf16.mxu0 %v2353_v59  ;;  %2070 = vmatprep.mubr.bf16.mxu1 %v564_v60 }
  0x62   : > { %2166 = vmatprep.mubr.bf16.mxu0 %v1687_v6  ;;  %v2831_v6 = vpack.c.bf16 %v2707_v42, %v2652_v52  ;;  %v2368_v52 = vld [vmem:[%s2956_s1 + $0xd0] sm:$0xff]  }
  0x63   : > { %2061 = vmatpush3.bf16.msra.mxu1 %v2352_v57  ;;  %v2369_v42 = vld [vmem:[%s2956_s1 + $0x1d0] sm:$0xff]  }
  0x64   : > { %2157 = vmatpush3.bf16.msra.mxu0 %v2353_v59  ;;  %2062 = vmatprep.subr.bf16.mxu1 %v2354_v9 }
  0x65   : > { %2158 = vmatprep.subr.bf16.mxu0 %v2355_v10 }
  0x67   : > { %2063 = vmatpush3.bf16.msra.mxu1 %v2354_v9 }
  0x68   : > { %2159 = vmatpush3.bf16.msra.mxu0 %v2355_v10  ;;  %2064 = vmatprep.subr.bf16.mxu1 %v2356_v28 }
  0x69   : > { %2160 = vmatprep.subr.bf16.mxu0 %v2357_v30 }
  0x6b   : > { %2065 = vmatpush3.bf16.msra.mxu1 %v2356_v28 }
  0x6c   : > { %2161 = vmatpush3.bf16.msra.mxu0 %v2357_v30  ;;  %2066 = vmatprep.subr.bf16.mxu1 %v2359_v35 }
  0x6d   : > { %2162 = vmatprep.subr.bf16.mxu0 %v2360_v46 }
  0x6f   : > { %2067 = vmatpush3.bf16.msra.mxu1 %v2359_v35 }
  0x70   : > { %2163 = vmatpush3.bf16.msra.mxu0 %v2360_v46  ;;  %2068 = vmatprep.subr.bf16.mxu1 %v2362_v29 }
  0x71   : > { %2164 = vmatprep.subr.bf16.mxu0 %v2363_v63 }
  0x73   : > { %2069 = vmatpush3.bf16.msra.mxu1 %v2362_v29 }
  0x74   : > { %2165 = vmatpush3.bf16.msra.mxu0 %v2363_v63  ;;  %2078 = vmatprep.subr.bf16.mxu1 %v2364_v0 }
  0x75   : > { %2174 = vmatprep.subr.bf16.mxu0 %v2365_v1 }
  0x76   : > { %2071 = vmatmul.mubr.bf16.vlgmr.msra.gmra.mrb[0].mxu1 %v2831_v6 }
  0x77   : > { %2079 = vmatpush3.bf16.msra.mxu1 %v2364_v0  ;;  %2167 = vmatmul.mubr.bf16.vlgmr.msra.gmra.mrb[0].mxu0 %v2748_v50  ;;  %v2374_v50 = vld [vmem:[%s2956_s1 + $0xe8] sm:$0xff]  }
  0x78   : > { %2175 = vmatpush3.bf16.msra.mxu0 %v2365_v1  ;;  %2080 = vmatprep.subr.bf16.mxu1 %v2366_v5 }
  0x79   : > { %2176 = vmatprep.subr.bf16.mxu0 %v2367_v40  ;;  %2074 = vmatprep.mubr.bf16.mxu1 %v2841_v41 }
  0x7a   : > { %2170 = vmatprep.mubr.bf16.mxu0 %v2771_v14 }
  0x7b   : > { %2081 = vmatpush3.bf16.msra.mxu1 %v2366_v5 }
  0x7c   : > { %2177 = vmatpush3.bf16.msra.mxu0 %v2367_v40  ;;  %2082 = vmatprep.subr.bf16.mxu1 %v2368_v52 }
  0x7d   : > { %2178 = vmatprep.subr.bf16.mxu0 %v2369_v42 }
  0x7e   : > { %2075 = vmatmul.mubr.bf16.gmra.mrb[4].mxu1 %v2855_v43 }
  0x7f   : > { %2083 = vmatpush3.bf16.msra.mxu1 %v2368_v52  ;;  %2171 = vmatmul.mubr.bf16.gmra.mrb[4].mxu0 %v1822_v11 }
  0x80   : > { %2179 = vmatpush3.bf16.msra.mxu0 %v2369_v42  ;;  %2084 = vmatprep.subr.bf16.mxu1 %v2370_v44 }
  0x81   : > { %2180 = vmatprep.subr.bf16.mxu0 %v2371_v48  ;;  %2094 = vmatprep.mubr.bf16.mxu1 %v1746_v38  ;;  %v2379_v38 = vld [vmem:[%s2956_s1 + $0xf8] sm:$0xff]  }
  0x82   : > { %2190 = vmatprep.mubr.bf16.mxu0 %v2566_v58  ;;  %v2380_v58 = vld [vmem:[%s2956_s1 + $0x1f8] sm:$0xff]  }
  0x83   : > { %2085 = vmatpush3.bf16.msra.mxu1 %v2370_v44 }
  0x84   : > { %2181 = vmatpush3.bf16.msra.mxu0 %v2371_v48  ;;  %2086 = vmatprep.subr.bf16.mxu1 %v2372_v22 }
  0x85   : > { %2182 = vmatprep.subr.bf16.mxu0 %v2373_v49 }
  0x87   : > { %2087 = vmatpush3.bf16.msra.mxu1 %v2372_v22 }
  0x88   : > { %2183 = vmatpush3.bf16.msra.mxu0 %v2373_v49  ;;  %2088 = vmatprep.subr.bf16.mxu1 %v2374_v50 }
  0x89   : > { %2184 = vmatprep.subr.bf16.mxu0 %v2375_v20 }
  0x8b   : > { %2089 = vmatpush3.bf16.msra.mxu1 %v2374_v50 }
  0x8c   : > { %2185 = vmatpush3.bf16.msra.mxu0 %v2375_v20  ;;  %2090 = vmatprep.subr.bf16.mxu1 %v2376_v15 }
  0x8d   : > { %2186 = vmatprep.subr.bf16.mxu0 %v2378_v21 }
  0x8f   : > { %2091 = vmatpush3.bf16.msra.mxu1 %v2376_v15 }
  0x90   : > { %2187 = vmatpush3.bf16.msra.mxu0 %v2378_v21  ;;  %2092 = vmatprep.subr.bf16.mxu1 %v2379_v38 }
  0x91   : > { %2188 = vmatprep.subr.bf16.mxu0 %v2380_v58 }
  0x93   : > { %2093 = vmatpush3.bf16.msra.mxu1 %v2379_v38 }
  0x94   : > { %2189 = vmatpush3.bf16.msra.mxu0 %v2380_v58  ;;  %2222 = vmatprep.subr.bf16.mxu1 %v2383_v23 }
  0x95   : > { %2198 = vmatprep.subr.bf16.mxu0 %v2383_v23 }
  0x96   : > { %2095 = vmatmul.mubr.bf16.vlgmr.msra.gmra.mrb[0].mxu1 %v1747_v47  ;;  %v2390_v47 = vld [vmem:[%s2956_s1 + $0x228] sm:$0xff]  }
  0x97   : > { %2191 = vmatmul.mubr.bf16.vlgmr.msra.gmra.mrb[0].mxu0 %v2631_v39  ;;  %2230 = vmatpush3.bf16.msra.mxu1 %v2383_v23 }
  0x98   : > { %2199 = vmatpush3.bf16.msra.mxu0 %v2383_v23  ;;  %2223 = vmatprep.subr.bf16.mxu1 %v2384_v33 }
  0x99   : > { %2200 = vmatprep.subr.bf16.mxu0 %v2384_v33  ;;  %2098 = vmatprep.mubr.bf16.mxu1 %v1748_v7 }
  0x9a   : > { %2194 = vmatprep.mubr.bf16.mxu0 %v2659_v55 }
  0x9b   : > { %2231 = vmatpush3.bf16.msra.mxu1 %v2384_v33 }
  0x9c   : > { %2201 = vmatpush3.bf16.msra.mxu0 %v2384_v33  ;;  %2224 = vmatprep.subr.bf16.mxu1 %v2387_v34 }
  0x9d   : > { %2202 = vmatprep.subr.bf16.mxu0 %v2387_v34 }
  0x9e   : > { %2099 = vmatmul.mubr.bf16.gmra.mrb[4].mxu1 %v1749_v45 }
  0x9f   : > { %2195 = vmatmul.mubr.bf16.gmra.mrb[4].mxu0 %v1287_v27  ;;  %2232 = vmatpush3.bf16.msra.mxu1 %v2387_v34 }
  0xa0   : > { %2203 = vmatpush3.bf16.msra.mxu0 %v2387_v34  ;;  %2225 = vmatprep.subr.bf16.mxu1 %v2388_v26 }
  0xa1   : > { %2204 = vmatprep.subr.bf16.mxu0 %v2388_v26  ;;  %2214 = vmatprep.mubr.bf16.mxu0 %v2831_v6 }
  0xa2   : > { %2218 = vmatprep.mubr.bf16.mxu1 %v2855_v43 }
  0xa3   : > { %2233 = vmatpush3.bf16.msra.mxu1 %v2388_v26 }
  0xa4   : > { %2205 = vmatpush3.bf16.msra.mxu0 %v2388_v26  ;;  %2226 = vmatprep.subr.bf16.mxu1 %v2389_v37 }
  0xa5   : > { %2206 = vmatprep.subr.bf16.mxu0 %v2389_v37 }
  0xa7   : > { %2234 = vmatpush3.bf16.msra.mxu1 %v2389_v37 }
  0xa8   : > { %2207 = vmatpush3.bf16.msra.mxu0 %v2389_v37  ;;  %2227 = vmatprep.subr.bf16.mxu1 %v2390_v47 }
  0xa9   : > { %2208 = vmatprep.subr.bf16.mxu0 %v2390_v47 }
  0xab   : > { %2235 = vmatpush3.bf16.msra.mxu1 %v2390_v47 }
  0xac   : > { %2209 = vmatpush3.bf16.msra.mxu0 %v2390_v47  ;;  %2228 = vmatprep.subr.bf16.mxu1 %v2391_v62 }
  0xad   : > { %2210 = vmatprep.subr.bf16.mxu0 %v2391_v62 }
  0xaf   : > { %2236 = vmatpush3.bf16.msra.mxu1 %v2391_v62 }
  0xb0   : > { %2211 = vmatpush3.bf16.msra.mxu0 %v2391_v62  ;;  %2229 = vmatprep.subr.bf16.mxu1 %v2392_v2 }
  0xb1   : > { %2212 = vmatprep.subr.bf16.mxu0 %v2392_v2 }
  0xb3   : > { %2237 = vmatpush3.bf16.msra.mxu1 %v2392_v2 }
  0xb4   : > { %2213 = vmatpush3.bf16.msra.mxu0 %v2392_v2 }
  0xb6   : > { %2219 = vmatmul.mubr.bf16.vlgmr.msra.gmra.mrb[8].mxu1 %v1430_v32 }
  0xb7   : > { %2215 = vmatmul.mubr.bf16.vlgmr.msra.gmra.mrb[0].mxu0 %v2841_v41 }
 0x169   : > { %v2096_v7 = vpop.f32.mrb[0].mxu1 }
 0x16a   : > { %v809_v12 = vpop.f32.mrb[1].mxu1 }
 0x16b   : > { %v2097_v24 = vpop.f32.mrb[2].mxu1 }
 0x16c   : > { %v812_v39 = vpop.f32.mrb[3].mxu1 }
 0x171   : > { %v2100_v45 = vpop.f32.mrb[4].mxu1 }
 0x172   : > { %v2196_v55 = vpop.f32.mrb[4].mxu0  ;;  %v825_v56 = vpop.f32.mrb[5].mxu1 }
 0x173   : > { %v2242_v36 = vadd.f32 %v2196_v55, %v2100_v45  ;;  %v1403_v13 = vpop.f32.mrb[5].mxu0  ;;  %v2101_v14 = vpop.f32.mrb[6].mxu1 }
 0x174   : > { %v2244_v17 = vadd.f32 %v1403_v13, %v825_v56  ;;  %v2197_v18 = vpop.f32.mrb[6].mxu0  ;;  %v828_v53 = vpop.f32.mrb[7].mxu1 }
 0x175   : > { %v2246_v54 = vadd.f32 %v2197_v18, %v2101_v14  ;;  %v1406_v31 = vpop.f32.mrb[7].mxu0 }
 0x176   : > { %v2248_v57 = vadd.f32 %v1406_v31, %v828_v53 }
 0x189   : > { %v2220_v59 = vpop.f32.mrb[8].mxu1 }
 0x18a   : > { %v2216_v60 = vpop.f32.mrb[0].mxu0  ;;  %v2243_v61 = vadd.f32 %v2242_v36, %v2220_v59  ;;  %v1546_v3 = vpop.f32.mrb[9].mxu1 }
 0x18b   : > { %v2238_v4 = vadd.f32 %v2216_v60, %v2096_v7  ;;  %v1530_v8 = vpop.f32.mrb[1].mxu0  ;;  %v2245_v9 = vadd.f32 %v2244_v17, %v1546_v3  ;;  %v2221_v10 = vpop.f32.mrb[10].mxu1 }
 0x18c   : > { %1575 = vst [vmem:[%s2433_s19 + $0x30] sm:$0xff] %v2243_v61  ;;  %v2239_v51 = vadd.f32 %v1530_v8, %v809_v12  ;;  %v2217_v16 = vpop.f32.mrb[2].mxu0  ;;  %v2247_v19 = vadd.f32 %v2246_v54, %v2221_v10  ;;  %v1549_v25 = vpop.f32.mrb[11].mxu1  ;;  %v1596_v48 = vmul.f32 %v2243_v61, %v2243_v61 }
 0x18d   : > { %1571 = vst [vmem:[%s2433_s19 + $0x10] sm:$0xff] %v2238_v4  ;;  %1573 = vst [vmem:[%s2433_s19 + $0x20] sm:$0xff] %v2245_v9  ;;  %v2240_v28 = vadd.f32 %v2217_v16, %v2097_v24  ;;  %v1533_v27 = vpop.f32.mrb[3].mxu0  ;;  %v2249_v32 = vadd.f32 %v2248_v57, %v1549_v25  ;;  %v1592_v63 = vmul.f32 %v2238_v4, %v2238_v4  ;;  %v1611_v24 = vld [vmem:[%s2958_s3] sm:$0x3] }
 0x18e   : > { %1569 = vst [vmem:[%s2433_s19] sm:$0xff] %v2239_v51  ;;  %1576 = vst [vmem:[%s2433_s19 + $0x38] sm:$0xff] %v2247_v19  ;;  %v2241_v30 = vadd.f32 %v1533_v27, %v812_v39  ;;  %v1590_v35 = vmul.f32 %v2239_v51, %v2239_v51  ;;  %v1594_v41 = vmul.f32 %v2245_v9, %v2245_v9 }
 0x18f   : > { %1572 = vst [vmem:[%s2433_s19 + $0x18] sm:$0xff] %v2240_v28  ;;  %1574 = vst [vmem:[%s2433_s19 + $0x28] sm:$0xff] %v2249_v32  ;;  %v1593_v6 = vmul.f32 %v2240_v28, %v2240_v28  ;;  %v1595_v11 = vmul.f32 %v2249_v32, %v2249_v32  ;;  %v1597_v50 = vmul.f32 %v2247_v19, %v2247_v19 }
 0x190   : > { %1570 = vst [vmem:[%s2433_s19 + $0x8] sm:$0xff] %v2241_v30  ;;  %v1577_v46 = vadd.f32 %v2241_v30, %v2239_v51  ;;  %v1591_v29 = vmul.f32 %v2241_v30, %v2241_v30 }
 0x192   : > { %v1578_v0 = vadd.f32 %v2238_v4, %v1577_v46  ;;  %v1598_v1 = vadd.f32 %v1591_v29, %v1590_v35 }
 0x194   : > { %v1599_v5 = vadd.f32 %v1598_v1, %v1592_v63  ;;  %v1579_v40 = vadd.f32 %v2240_v28, %v1578_v0 }
 0x196   : > { %v1580_v52 = vadd.f32 %v2245_v9, %v1579_v40  ;;  %v1600_v42 = vadd.f32 %v1599_v5, %v1593_v6 }
 0x198   : > { %v1581_v43 = vadd.f32 %v2249_v32, %v1580_v52  ;;  %v1601_v44 = vadd.f32 %v1600_v42, %v1594_v41 }
 0x19a   : > { %v1582_v22 = vadd.f32 %v2243_v61, %v1581_v43  ;;  %v1602_v49 = vadd.f32 %v1601_v44, %v1595_v11 }
 0x19c   : > { %v1583_v20 = vadd.f32 %v2247_v19, %v1582_v22  ;;  %v1603_v15 = vadd.f32 %v1602_v49, %v1596_v48 }
 0x19e   : > { %v1584_v21 = vrot.slane %v1583_v20, 4  ;;  %v1604_v38 = vadd.f32 %v1603_v15, %v1597_v50 }
 0x1a0   : > { %v1585_v58 = vadd.f32 %v1584_v21, %v1583_v20  ;;  %v1605_v23 = vrot.slane %v1604_v38, 4 }
 0x1a2   : > { %v1586_v33 = vrot.slane %v1585_v58, 2  ;;  %v1606_v34 = vadd.f32 %v1605_v23, %v1604_v38 }
 0x1a4   : > { %v1587_v26 = vadd.f32 %v1586_v33, %v1585_v58  ;;  %v1607_v37 = vrot.slane %v1606_v34, 2 }
 0x1a6   : > { %v1588_v47 = vrot.slane %v1587_v26, 1  ;;  %v1608_v62 = vadd.f32 %v1607_v37, %v1606_v34 }
 0x1a8   : > { %v1609_v2 = vrot.slane %v1608_v62, 1  ;;  %v1589_v7 = vadd.f32 %v1588_v47, %v1587_v26 }
 0x1aa   : > { %v1610_v12 = vadd.f32 %v1609_v2, %v1608_v62 }
 0x1ac   : > { %v1613_v39 = vsel %vm1612_vm2, %v1589_v7, %v1610_v12 }
 0x1ad   : > { %v1614_v45 = vadd.f32 %v1613_v39, %v1611_v24 }
 0x1af   : > { %1615 = vst [vmem:[%s2958_s3] sm:$0x3] %v1614_v45 }
 0x1b0 PF: > { %s14_s12 = sadd.s32 1, %s2399_s12  }
 0x1b1   : > { %p11_p5 = scmp.ge.s32.totalorder %s14_s12, 4  }
 0x1b3   :  { %13 = sbr.rel (!%p11_p5) target bundleno = 1 (0x1), region = 78 }

</bundles_post_ra>
